<compile_context>
chip_gen: v5e
topology: v5e:2x2
jax: 0.10.0
libtpu: 0.0.40
codegen_flags: <defaults>
</compile_context>

<pallas_src>
import math

import jax
import jax.numpy as jnp
from jax import lax
from jax.experimental import pallas as pl
from jax.experimental.pallas import tpu as pltpu


# ----------------------------------------------------------------------------
# helpers
# ----------------------------------------------------------------------------
_INV_SQRT2 = 0.7071067811865476


def _gelu(x):
    # exact GELU (PyTorch F.gelu default, approximate='none'); f32 on the VPU/EUP
    return 0.5 * x * (1.0 + lax.erf(x * _INV_SQRT2))


def _shift_rows(x, s, T):
    """out[t] = x[t + s]; zero where t + s falls outside [0, T).  s static."""
    if s == 0:
        return x
    if abs(s) >= T:
        return jnp.zeros_like(x)
    rolled = pltpu.roll(x, shift=(-s) % T, axis=0)          # XLU sublane rotate
    rows = lax.broadcasted_iota(jnp.int32, x.shape, 0)
    if s > 0:
        return jnp.where(rows < T - s, rolled, 0.0)
    return jnp.where(rows >= -s, rolled, 0.0)


def _dilated_conv3(g, w_flat, b, d, T, mx_dtype):
    """kernel-size-3 dilated 'same' conv as one (T,3C)x(3C,Cout) MXU matmul."""
    taps = jnp.concatenate(
        [_shift_rows(g, -d, T), g, _shift_rows(g, d, T)], axis=-1)
    return jnp.dot(taps.astype(mx_dtype), w_flat,
                   preferred_element_type=jnp.float32) + b


# ----------------------------------------------------------------------------
# fused kernel: nan-mask + input_fc + all ConvBlocks, one grid step per batch
# ----------------------------------------------------------------------------
def _make_fused_kernel(T, cfgs, mx_dtype):
    def kernel(*refs):
        it = iter(refs)
        x_ref = next(it)
        w_in_ref = next(it)
        b_in_ref = next(it)
        blk_refs = []
        for cfg in cfgs:
            r = {"w1": next(it), "b1": next(it), "w2": next(it), "b2": next(it)}
            if cfg["has_proj"]:
                r["wp"] = next(it)
                r["bp"] = next(it)
            blk_refs.append(r)
        o_ref = next(it)

        # --- nan mask + input_fc ------------------------------------------
        x = x_ref[0]                                          # (T, Din) f32
        nan_cnt = jnp.sum(jnp.where(x != x, 1.0, 0.0), axis=-1, keepdims=True)
        nan_row = nan_cnt > 0.0                               # (T, 1)
        x = jnp.where(nan_row, 0.0, x)
        h = (jnp.dot(x.astype(mx_dtype), w_in_ref[...],
                     preferred_element_type=jnp.float32) + b_in_ref[...])
        h = jnp.where(nan_row, 0.0, h)                        # x[~mask] = 0

        # --- dilated conv encoder (unrolled over blocks) -------------------
        for cfg, r in zip(cfgs, blk_refs):
            d = cfg["d"]
            if cfg["has_proj"]:
                residual = (jnp.dot(h.astype(mx_dtype), r["wp"][...],
                                    preferred_element_type=jnp.float32)
                            + r["bp"][...])
            else:
                residual = h
            g = _gelu(h)
            c1 = _dilated_conv3(g, r["w1"][...], r["b1"][...], d, T, mx_dtype)
            g2 = _gelu(c1)
            c2 = _dilated_conv3(g2, r["w2"][...], r["b2"][...], d, T, mx_dtype)
            h = c2 + residual

        # repr_dropout: identity in eval mode
        o_ref[0] = h.astype(o_ref.dtype)

    return kernel


def ts_encoder_forward(x, packed):
    """Fused TSEncoder forward (eval mode): one pallas_call, grid over batch."""
    x = x.astype(jnp.float32)
    B, T, Din = x.shape
    cfgs = packed["cfgs"]
    mx_dtype = packed["w_in"].dtype
    cout_last = cfgs[-1]["cout"]

    args = [x, packed["w_in"], packed["b_in"]]
    in_specs = [
        pl.BlockSpec((1, T, Din), lambda b: (b, 0, 0)),
        pl.BlockSpec(packed["w_in"].shape, lambda b: (0, 0)),
        pl.BlockSpec(packed["b_in"].shape, lambda b: (0, 0)),
    ]
    for blk in packed["blocks"]:
        for name in ("w1", "b1", "w2", "b2", "wp", "bp"):
            if name in blk:
                args.append(blk[name])
                in_specs.append(pl.BlockSpec(blk[name].shape, lambda b: (0, 0)))

    kernel = _make_fused_kernel(T, cfgs, mx_dtype)

    # explicit scoped-VMEM budget sized from the blocks (never rely on defaults)
    per_step_in = T * Din * 4 + sum(int(a.size) * a.dtype.itemsize
                                    for a in args[1:])
    per_step_out = T * cout_last * 4
    cmax = max(max(3 * c["cin"], 3 * c["cout"]) for c in cfgs)
    work = 24 * T * cmax * 4                                  # live f32 values
    vmem_limit = int(min(max(2 * (per_step_in + per_step_out) + work + (2 << 20),
                             16 << 20), 56 << 20))

    return pl.pallas_call(
        kernel,
        out_shape=jax.ShapeDtypeStruct((B, T, cout_last), jnp.float32),
        grid=(B,),
        in_specs=in_specs,
        out_specs=pl.BlockSpec((1, T, cout_last), lambda b: (b, 0, 0)),
        compiler_params=pltpu.CompilerParams(
            dimension_semantics=("parallel",),
            vmem_limit_bytes=vmem_limit),
    )(*args)


# ----------------------------------------------------------------------------
# parameter init (synthetic weights, PyTorch-equivalent shapes) and packing
# conv weights stored as (K, Cin, Cout) == transpose of PyTorch (Cout, Cin, K)
# ----------------------------------------------------------------------------
def init_params(key, input_dim, hidden_dim, output_dim, depth):
    chans = [hidden_dim] * depth + [output_dim]
    k = key

    def nxt():
        nonlocal k
        k, sub = jax.random.split(k)
        return sub

    params = {
        "w_in": jax.random.normal(nxt(), (input_dim, hidden_dim), jnp.float32)
                * (1.0 / math.sqrt(input_dim)),
        "b_in": jax.random.normal(nxt(), (1, hidden_dim), jnp.float32) * 0.05,
    }
    blocks = []
    in_c = hidden_dim
    for i, out_c in enumerate(chans):
        final = (i == len(chans) - 1)
        has_proj = (in_c != out_c) or final
        blk = {
            "dilation": 2 ** i,
            "has_proj": has_proj,
            "w1": jax.random.normal(nxt(), (3, in_c, out_c), jnp.float32)
                  * (0.5 / math.sqrt(3 * in_c)),
            "b1": jax.random.normal(nxt(), (1, out_c), jnp.float32) * 0.05,
            "w2": jax.random.normal(nxt(), (3, out_c, out_c), jnp.float32)
                  * (0.5 / math.sqrt(3 * out_c)),
            "b2": jax.random.normal(nxt(), (1, out_c), jnp.float32) * 0.05,
        }
        if has_proj:
            blk["wp"] = jax.random.normal(nxt(), (in_c, out_c), jnp.float32) \
                        * (0.5 / math.sqrt(in_c))
            blk["bp"] = jax.random.normal(nxt(), (1, out_c), jnp.float32) * 0.05
        blocks.append(blk)
        in_c = out_c
    params["blocks"] = blocks
    return params


def pack_params(params, use_bf16=True):
    """Kernel-ready params: bf16 matmul weights, tap-flattened conv weights."""
    mx = jnp.bfloat16 if use_bf16 else jnp.float32
    packed = {
        "w_in": params["w_in"].astype(mx),
        "b_in": params["b_in"].astype(jnp.float32),
        "blocks": [],
        "cfgs": [],
    }
    for blk in params["blocks"]:
        K, cin, cout = blk["w1"].shape
        entry = {
            "w1": blk["w1"].reshape(K * cin, cout).astype(mx),
            "b1": blk["b1"].astype(jnp.float32),
            "w2": blk["w2"].reshape(K * cout, cout).astype(mx),
            "b2": blk["b2"].astype(jnp.float32),
        }
        if blk["has_proj"]:
            entry["wp"] = blk["wp"].astype(mx)
            entry["bp"] = blk["bp"].astype(jnp.float32)
        packed["blocks"].append(entry)
        packed["cfgs"].append(dict(d=int(blk["dilation"]), cin=int(cin),
                                   cout=int(cout), has_proj=bool(blk["has_proj"])))
    return packed


# ----------------------------------------------------------------------------
# plain-JAX reference (same bf16-operand / f32-accumulate numerics)
# ----------------------------------------------------------------------------
def _ref_dilated_conv(x, w, b, d, mx):
    y = lax.conv_general_dilated(
        x.astype(mx), w.astype(mx), window_strides=(1,), padding=[(d, d)],
        rhs_dilation=(d,), dimension_numbers=("NWC", "WIO", "NWC"),
        preferred_element_type=jnp.float32)
    return y + b


def ts_encoder_ref(x, params, use_bf16=True):
    mx = jnp.bfloat16 if use_bf16 else jnp.float32
    x = x.astype(jnp.float32)
    nan_row = jnp.any(jnp.isnan(x), axis=-1, keepdims=True)
    xz = jnp.where(nan_row, 0.0, x)
    h = jnp.einsum("btd,dh->bth", xz.astype(mx), params["w_in"].astype(mx),
                   preferred_element_type=jnp.float32) + params["b_in"]
    h = jnp.where(nan_row, 0.0, h)
    for blk in params["blocks"]:
        d = blk["dilation"]
        if blk["has_proj"]:
            res = jnp.einsum("btc,co->bto", h.astype(mx), blk["wp"].astype(mx),
                             preferred_element_type=jnp.float32) + blk["bp"]
        else:
            res = h
        g = _gelu(h)
        c1 = _ref_dilated_conv(g, blk["w1"], blk["b1"], d, mx)
        c2 = _ref_dilated_conv(_gelu(c1), blk["w2"], blk["b2"], d, mx)
        h = c2 + res
    return h


# ----------------------------------------------------------------------------
if __name__ == "__main__":
    B, T = 2, 16
    input_dim, hidden_dim, output_dim, depth = 4, 32, 16, 3

    root = jax.random.PRNGKey(0)
    k_params, k_x = jax.random.split(root)
    params = init_params(k_params, input_dim, hidden_dim, output_dim, depth)
    x = jax.random.normal(k_x, (B, T, input_dim), jnp.float32)
    # exercise the NaN-row path
    x = x.at[0, 3, 1].set(jnp.nan)

    packed = pack_params(params, use_bf16=True)
    y = ts_encoder_forward(x, packed)
    y = jax.block_until_ready(y)
    assert y.shape == (B, T, output_dim)

    y_ref = ts_encoder_ref(x, params, use_bf16=True)
    if not jnp.allclose(y, y_ref, rtol=1e-2, atol=1e-2):
        raise AssertionError("Pallas TSEncoder output mismatch vs JAX reference")

    print("KERNEL_OK")
</pallas_src>

<mosaic_0001>
module attributes {stable_mosaic.version = 11 : i64} {
  func.func @kernel(%arg0: i32, %arg1: memref<1x16x4xf32, #tpu.memory_space<vmem>>, %arg2: memref<4x32xbf16, #tpu.memory_space<vmem>>, %arg3: memref<1x32xf32, #tpu.memory_space<vmem>>, %arg4: memref<96x32xbf16, #tpu.memory_space<vmem>>, %arg5: memref<1x32xf32, #tpu.memory_space<vmem>>, %arg6: memref<96x32xbf16, #tpu.memory_space<vmem>>, %arg7: memref<1x32xf32, #tpu.memory_space<vmem>>, %arg8: memref<96x32xbf16, #tpu.memory_space<vmem>>, %arg9: memref<1x32xf32, #tpu.memory_space<vmem>>, %arg10: memref<96x32xbf16, #tpu.memory_space<vmem>>, %arg11: memref<1x32xf32, #tpu.memory_space<vmem>>, %arg12: memref<96x32xbf16, #tpu.memory_space<vmem>>, %arg13: memref<1x32xf32, #tpu.memory_space<vmem>>, %arg14: memref<96x32xbf16, #tpu.memory_space<vmem>>, %arg15: memref<1x32xf32, #tpu.memory_space<vmem>>, %arg16: memref<96x16xbf16, #tpu.memory_space<vmem>>, %arg17: memref<1x16xf32, #tpu.memory_space<vmem>>, %arg18: memref<48x16xbf16, #tpu.memory_space<vmem>>, %arg19: memref<1x16xf32, #tpu.memory_space<vmem>>, %arg20: memref<32x16xbf16, #tpu.memory_space<vmem>>, %arg21: memref<1x16xf32, #tpu.memory_space<vmem>>, %arg22: memref<1x16x16xf32, #tpu.memory_space<vmem>>) attributes {dimension_semantics = [#tpu.dimension_semantics<parallel>], iteration_bounds = array<i64: 2>, scalar_prefetch = 0 : i64, scratch_operands = 0 : i64, tpu.core_type = #tpu.core_type<tc>, window_params = [{transform_indices = @transform_0, window_bounds = array<i64: 1, 16, 4>}, {pipeline_mode = #tpu.pipeline_mode<synchronous>, transform_indices = @transform_1, window_bounds = array<i64: 4, 32>}, {pipeline_mode = #tpu.pipeline_mode<synchronous>, transform_indices = @transform_2, window_bounds = array<i64: 1, 32>}, {pipeline_mode = #tpu.pipeline_mode<synchronous>, transform_indices = @transform_3, window_bounds = array<i64: 96, 32>}, {pipeline_mode = #tpu.pipeline_mode<synchronous>, transform_indices = @transform_4, window_bounds = array<i64: 1, 32>}, {pipeline_mode = #tpu.pipeline_mode<synchronous>, transform_indices = @transform_5, window_bounds = array<i64: 96, 32>}, {pipeline_mode = #tpu.pipeline_mode<synchronous>, transform_indices = @transform_6, window_bounds = array<i64: 1, 32>}, {pipeline_mode = #tpu.pipeline_mode<synchronous>, transform_indices = @transform_7, window_bounds = array<i64: 96, 32>}, {pipeline_mode = #tpu.pipeline_mode<synchronous>, transform_indices = @transform_8, window_bounds = array<i64: 1, 32>}, {pipeline_mode = #tpu.pipeline_mode<synchronous>, transform_indices = @transform_9, window_bounds = array<i64: 96, 32>}, {pipeline_mode = #tpu.pipeline_mode<synchronous>, transform_indices = @transform_10, window_bounds = array<i64: 1, 32>}, {pipeline_mode = #tpu.pipeline_mode<synchronous>, transform_indices = @transform_11, window_bounds = array<i64: 96, 32>}, {pipeline_mode = #tpu.pipeline_mode<synchronous>, transform_indices = @transform_12, window_bounds = array<i64: 1, 32>}, {pipeline_mode = #tpu.pipeline_mode<synchronous>, transform_indices = @transform_13, window_bounds = array<i64: 96, 32>}, {pipeline_mode = #tpu.pipeline_mode<synchronous>, transform_indices = @transform_14, window_bounds = array<i64: 1, 32>}, {pipeline_mode = #tpu.pipeline_mode<synchronous>, transform_indices = @transform_15, window_bounds = array<i64: 96, 16>}, {pipeline_mode = #tpu.pipeline_mode<synchronous>, transform_indices = @transform_16, window_bounds = array<i64: 1, 16>}, {pipeline_mode = #tpu.pipeline_mode<synchronous>, transform_indices = @transform_17, window_bounds = array<i64: 48, 16>}, {pipeline_mode = #tpu.pipeline_mode<synchronous>, transform_indices = @transform_18, window_bounds = array<i64: 1, 16>}, {pipeline_mode = #tpu.pipeline_mode<synchronous>, transform_indices = @transform_19, window_bounds = array<i64: 32, 16>}, {pipeline_mode = #tpu.pipeline_mode<synchronous>, transform_indices = @transform_20, window_bounds = array<i64: 1, 16>}, {transform_indices = @transform_21, window_bounds = array<i64: 1, 16, 16>}]} {
    %c0 = arith.constant 0 : index
    %c0_0 = arith.constant 0 : index
    %c0_1 = arith.constant 0 : index
    %0 = vector.load %arg1[%c0, %c0_0, %c0_1] : memref<1x16x4xf32, #tpu.memory_space<vmem>>, vector<1x16x4xf32>
    %1 = vector.shape_cast %0 : vector<1x16x4xf32> to vector<16x4xf32>
    %2 = arith.cmpf one, %1, %1 : vector<16x4xf32>
    %cst = arith.constant 1.000000e+00 : f32
    %cst_2 = arith.constant 0.000000e+00 : f32
    %3 = vector.broadcast %cst : f32 to vector<16x4xf32>
    %4 = vector.broadcast %cst_2 : f32 to vector<16x4xf32>
    %5 = arith.select %2, %3, %4 : vector<16x4xi1>, vector<16x4xf32>
    %cst_3 = arith.constant dense<0.000000e+00> : vector<16xf32>
    %6 = vector.multi_reduction <add>, %5, %cst_3 [1] : vector<16x4xf32> to vector<16xf32>
    %7 = vector.shape_cast %6 : vector<16xf32> to vector<16x1xf32>
    %cst_4 = arith.constant 0.000000e+00 : f32
    %8 = vector.broadcast %cst_4 : f32 to vector<16x1xf32>
    %9 = arith.cmpf ogt, %7, %8 : vector<16x1xf32>
    %cst_5 = arith.constant 0.000000e+00 : f32
    %10 = vector.shape_cast %9 : vector<16x1xi1> to vector<16x1xi1>
    %11 = vector.broadcast %10 : vector<16x1xi1> to vector<16x4xi1>
    %12 = vector.broadcast %cst_5 : f32 to vector<16x4xf32>
    %13 = arith.select %11, %12, %1 : vector<16x4xi1>, vector<16x4xf32>
    %14 = arith.truncf %13 : vector<16x4xf32> to vector<16x4xbf16>
    %c0_6 = arith.constant 0 : index
    %c0_7 = arith.constant 0 : index
    %15 = vector.load %arg2[%c0_6, %c0_7] : memref<4x32xbf16, #tpu.memory_space<vmem>>, vector<4x32xbf16>
    %cst_8 = arith.constant dense<0.000000e+00> : vector<16x32xf32>
    %16 = tpu.matmul %14, %15, %cst_8 {dimension_numbers = #tpu.dot_dimension_numbers<[1], [0], [0], [1], [0, 0, 1, 1], [], []>} : vector<16x4xbf16>, vector<4x32xbf16>, vector<16x32xf32> -> vector<16x32xf32>
    %c0_9 = arith.constant 0 : index
    %c0_10 = arith.constant 0 : index
    %17 = vector.load %arg3[%c0_9, %c0_10] : memref<1x32xf32, #tpu.memory_space<vmem>>, vector<1x32xf32>
    %18 = vector.broadcast %17 : vector<1x32xf32> to vector<16x32xf32>
    %19 = arith.addf %16, %18 : vector<16x32xf32>
    %cst_11 = arith.constant 0.000000e+00 : f32
    %20 = vector.shape_cast %9 : vector<16x1xi1> to vector<16x1xi1>
    %21 = vector.broadcast %20 : vector<16x1xi1> to vector<16x32xi1>
    %22 = vector.broadcast %cst_11 : f32 to vector<16x32xf32>
    %23 = arith.select %21, %22, %19 : vector<16x32xi1>, vector<16x32xf32>
    %cst_12 = arith.constant 5.000000e-01 : f32
    %24 = vector.broadcast %cst_12 : f32 to vector<16x32xf32>
    %25 = arith.mulf %24, %23 : vector<16x32xf32>
    %cst_13 = arith.constant 0.707106769 : f32
    %26 = vector.broadcast %cst_13 : f32 to vector<16x32xf32>
    %27 = arith.mulf %23, %26 : vector<16x32xf32>
    %28 = math.erf %27 : vector<16x32xf32>
    %cst_14 = arith.constant 1.000000e+00 : f32
    %29 = vector.broadcast %cst_14 : f32 to vector<16x32xf32>
    %30 = arith.addf %29, %28 : vector<16x32xf32>
    %31 = arith.mulf %25, %30 : vector<16x32xf32>
    %c0_15 = arith.constant 0 : index
    %c0_16 = arith.constant 0 : index
    %32 = vector.load %arg4[%c0_15, %c0_16] : memref<96x32xbf16, #tpu.memory_space<vmem>>, vector<96x32xbf16>
    %c0_17 = arith.constant 0 : index
    %c0_18 = arith.constant 0 : index
    %33 = vector.load %arg5[%c0_17, %c0_18] : memref<1x32xf32, #tpu.memory_space<vmem>>, vector<1x32xf32>
    %c1_i32 = arith.constant 1 : i32
    %34 = tpu.dynamic_rotate %31 by %c1_i32 dim 0 : vector<16x32xf32>, i32 -> vector<16x32xf32>
    %35 = tpu.iota {dimensions = array<i32: 0>} : vector<16x32xi32>
    %c1_i32_19 = arith.constant 1 : i32
    %36 = vector.broadcast %c1_i32_19 : i32 to vector<16x32xi32>
    %37 = arith.cmpi sge, %35, %36 : vector<16x32xi32>
    %cst_20 = arith.constant 0.000000e+00 : f32
    %38 = vector.broadcast %cst_20 : f32 to vector<16x32xf32>
    %39 = arith.select %37, %34, %38 : vector<16x32xi1>, vector<16x32xf32>
    %c15_i32 = arith.constant 15 : i32
    %40 = tpu.dynamic_rotate %31 by %c15_i32 dim 0 : vector<16x32xf32>, i32 -> vector<16x32xf32>
    %41 = tpu.iota {dimensions = array<i32: 0>} : vector<16x32xi32>
    %c15_i32_21 = arith.constant 15 : i32
    %42 = vector.broadcast %c15_i32_21 : i32 to vector<16x32xi32>
    %43 = arith.cmpi slt, %41, %42 : vector<16x32xi32>
    %cst_22 = arith.constant 0.000000e+00 : f32
    %44 = vector.broadcast %cst_22 : f32 to vector<16x32xf32>
    %45 = arith.select %43, %40, %44 : vector<16x32xi1>, vector<16x32xf32>
    %46 = tpu.concatenate %39, %31, %45 in 1 : vector<16x32xf32>, vector<16x32xf32>, vector<16x32xf32> -> vector<16x96xf32>
    %47 = arith.truncf %46 : vector<16x96xf32> to vector<16x96xbf16>
    %cst_23 = arith.constant dense<0.000000e+00> : vector<16x32xf32>
    %48 = tpu.matmul %47, %32, %cst_23 {dimension_numbers = #tpu.dot_dimension_numbers<[1], [0], [0], [1], [0, 0, 1, 1], [], []>} : vector<16x96xbf16>, vector<96x32xbf16>, vector<16x32xf32> -> vector<16x32xf32>
    %49 = vector.broadcast %33 : vector<1x32xf32> to vector<16x32xf32>
    %50 = arith.addf %48, %49 : vector<16x32xf32>
    %cst_24 = arith.constant 5.000000e-01 : f32
    %51 = vector.broadcast %cst_24 : f32 to vector<16x32xf32>
    %52 = arith.mulf %51, %50 : vector<16x32xf32>
    %cst_25 = arith.constant 0.707106769 : f32
    %53 = vector.broadcast %cst_25 : f32 to vector<16x32xf32>
    %54 = arith.mulf %50, %53 : vector<16x32xf32>
    %55 = math.erf %54 : vector<16x32xf32>
    %cst_26 = arith.constant 1.000000e+00 : f32
    %56 = vector.broadcast %cst_26 : f32 to vector<16x32xf32>
    %57 = arith.addf %56, %55 : vector<16x32xf32>
    %58 = arith.mulf %52, %57 : vector<16x32xf32>
    %c0_27 = arith.constant 0 : index
    %c0_28 = arith.constant 0 : index
    %59 = vector.load %arg6[%c0_27, %c0_28] : memref<96x32xbf16, #tpu.memory_space<vmem>>, vector<96x32xbf16>
    %c0_29 = arith.constant 0 : index
    %c0_30 = arith.constant 0 : index
    %60 = vector.load %arg7[%c0_29, %c0_30] : memref<1x32xf32, #tpu.memory_space<vmem>>, vector<1x32xf32>
    %c1_i32_31 = arith.constant 1 : i32
    %61 = tpu.dynamic_rotate %58 by %c1_i32_31 dim 0 : vector<16x32xf32>, i32 -> vector<16x32xf32>
    %62 = tpu.iota {dimensions = array<i32: 0>} : vector<16x32xi32>
    %c1_i32_32 = arith.constant 1 : i32
    %63 = vector.broadcast %c1_i32_32 : i32 to vector<16x32xi32>
    %64 = arith.cmpi sge, %62, %63 : vector<16x32xi32>
    %cst_33 = arith.constant 0.000000e+00 : f32
    %65 = vector.broadcast %cst_33 : f32 to vector<16x32xf32>
    %66 = arith.select %64, %61, %65 : vector<16x32xi1>, vector<16x32xf32>
    %c15_i32_34 = arith.constant 15 : i32
    %67 = tpu.dynamic_rotate %58 by %c15_i32_34 dim 0 : vector<16x32xf32>, i32 -> vector<16x32xf32>
    %68 = tpu.iota {dimensions = array<i32: 0>} : vector<16x32xi32>
    %c15_i32_35 = arith.constant 15 : i32
    %69 = vector.broadcast %c15_i32_35 : i32 to vector<16x32xi32>
    %70 = arith.cmpi slt, %68, %69 : vector<16x32xi32>
    %cst_36 = arith.constant 0.000000e+00 : f32
    %71 = vector.broadcast %cst_36 : f32 to vector<16x32xf32>
    %72 = arith.select %70, %67, %71 : vector<16x32xi1>, vector<16x32xf32>
    %73 = tpu.concatenate %66, %58, %72 in 1 : vector<16x32xf32>, vector<16x32xf32>, vector<16x32xf32> -> vector<16x96xf32>
    %74 = arith.truncf %73 : vector<16x96xf32> to vector<16x96xbf16>
    %cst_37 = arith.constant dense<0.000000e+00> : vector<16x32xf32>
    %75 = tpu.matmul %74, %59, %cst_37 {dimension_numbers = #tpu.dot_dimension_numbers<[1], [0], [0], [1], [0, 0, 1, 1], [], []>} : vector<16x96xbf16>, vector<96x32xbf16>, vector<16x32xf32> -> vector<16x32xf32>
    %76 = vector.broadcast %60 : vector<1x32xf32> to vector<16x32xf32>
    %77 = arith.addf %75, %76 : vector<16x32xf32>
    %78 = arith.addf %77, %23 : vector<16x32xf32>
    %cst_38 = arith.constant 5.000000e-01 : f32
    %79 = vector.broadcast %cst_38 : f32 to vector<16x32xf32>
    %80 = arith.mulf %79, %78 : vector<16x32xf32>
    %cst_39 = arith.constant 0.707106769 : f32
    %81 = vector.broadcast %cst_39 : f32 to vector<16x32xf32>
    %82 = arith.mulf %78, %81 : vector<16x32xf32>
    %83 = math.erf %82 : vector<16x32xf32>
    %cst_40 = arith.constant 1.000000e+00 : f32
    %84 = vector.broadcast %cst_40 : f32 to vector<16x32xf32>
    %85 = arith.addf %84, %83 : vector<16x32xf32>
    %86 = arith.mulf %80, %85 : vector<16x32xf32>
    %c0_41 = arith.constant 0 : index
    %c0_42 = arith.constant 0 : index
    %87 = vector.load %arg8[%c0_41, %c0_42] : memref<96x32xbf16, #tpu.memory_space<vmem>>, vector<96x32xbf16>
    %c0_43 = arith.constant 0 : index
    %c0_44 = arith.constant 0 : index
    %88 = vector.load %arg9[%c0_43, %c0_44] : memref<1x32xf32, #tpu.memory_space<vmem>>, vector<1x32xf32>
    %c2_i32 = arith.constant 2 : i32
    %89 = tpu.dynamic_rotate %86 by %c2_i32 dim 0 : vector<16x32xf32>, i32 -> vector<16x32xf32>
    %90 = tpu.iota {dimensions = array<i32: 0>} : vector<16x32xi32>
    %c2_i32_45 = arith.constant 2 : i32
    %91 = vector.broadcast %c2_i32_45 : i32 to vector<16x32xi32>
    %92 = arith.cmpi sge, %90, %91 : vector<16x32xi32>
    %cst_46 = arith.constant 0.000000e+00 : f32
    %93 = vector.broadcast %cst_46 : f32 to vector<16x32xf32>
    %94 = arith.select %92, %89, %93 : vector<16x32xi1>, vector<16x32xf32>
    %c14_i32 = arith.constant 14 : i32
    %95 = tpu.dynamic_rotate %86 by %c14_i32 dim 0 : vector<16x32xf32>, i32 -> vector<16x32xf32>
    %96 = tpu.iota {dimensions = array<i32: 0>} : vector<16x32xi32>
    %c14_i32_47 = arith.constant 14 : i32
    %97 = vector.broadcast %c14_i32_47 : i32 to vector<16x32xi32>
    %98 = arith.cmpi slt, %96, %97 : vector<16x32xi32>
    %cst_48 = arith.constant 0.000000e+00 : f32
    %99 = vector.broadcast %cst_48 : f32 to vector<16x32xf32>
    %100 = arith.select %98, %95, %99 : vector<16x32xi1>, vector<16x32xf32>
    %101 = tpu.concatenate %94, %86, %100 in 1 : vector<16x32xf32>, vector<16x32xf32>, vector<16x32xf32> -> vector<16x96xf32>
    %102 = arith.truncf %101 : vector<16x96xf32> to vector<16x96xbf16>
    %cst_49 = arith.constant dense<0.000000e+00> : vector<16x32xf32>
    %103 = tpu.matmul %102, %87, %cst_49 {dimension_numbers = #tpu.dot_dimension_numbers<[1], [0], [0], [1], [0, 0, 1, 1], [], []>} : vector<16x96xbf16>, vector<96x32xbf16>, vector<16x32xf32> -> vector<16x32xf32>
    %104 = vector.broadcast %88 : vector<1x32xf32> to vector<16x32xf32>
    %105 = arith.addf %103, %104 : vector<16x32xf32>
    %cst_50 = arith.constant 5.000000e-01 : f32
    %106 = vector.broadcast %cst_50 : f32 to vector<16x32xf32>
    %107 = arith.mulf %106, %105 : vector<16x32xf32>
    %cst_51 = arith.constant 0.707106769 : f32
    %108 = vector.broadcast %cst_51 : f32 to vector<16x32xf32>
    %109 = arith.mulf %105, %108 : vector<16x32xf32>
    %110 = math.erf %109 : vector<16x32xf32>
    %cst_52 = arith.constant 1.000000e+00 : f32
    %111 = vector.broadcast %cst_52 : f32 to vector<16x32xf32>
    %112 = arith.addf %111, %110 : vector<16x32xf32>
    %113 = arith.mulf %107, %112 : vector<16x32xf32>
    %c0_53 = arith.constant 0 : index
    %c0_54 = arith.constant 0 : index
    %114 = vector.load %arg10[%c0_53, %c0_54] : memref<96x32xbf16, #tpu.memory_space<vmem>>, vector<96x32xbf16>
    %c0_55 = arith.constant 0 : index
    %c0_56 = arith.constant 0 : index
    %115 = vector.load %arg11[%c0_55, %c0_56] : memref<1x32xf32, #tpu.memory_space<vmem>>, vector<1x32xf32>
    %c2_i32_57 = arith.constant 2 : i32
    %116 = tpu.dynamic_rotate %113 by %c2_i32_57 dim 0 : vector<16x32xf32>, i32 -> vector<16x32xf32>
    %117 = tpu.iota {dimensions = array<i32: 0>} : vector<16x32xi32>
    %c2_i32_58 = arith.constant 2 : i32
    %118 = vector.broadcast %c2_i32_58 : i32 to vector<16x32xi32>
    %119 = arith.cmpi sge, %117, %118 : vector<16x32xi32>
    %cst_59 = arith.constant 0.000000e+00 : f32
    %120 = vector.broadcast %cst_59 : f32 to vector<16x32xf32>
    %121 = arith.select %119, %116, %120 : vector<16x32xi1>, vector<16x32xf32>
    %c14_i32_60 = arith.constant 14 : i32
    %122 = tpu.dynamic_rotate %113 by %c14_i32_60 dim 0 : vector<16x32xf32>, i32 -> vector<16x32xf32>
    %123 = tpu.iota {dimensions = array<i32: 0>} : vector<16x32xi32>
    %c14_i32_61 = arith.constant 14 : i32
    %124 = vector.broadcast %c14_i32_61 : i32 to vector<16x32xi32>
    %125 = arith.cmpi slt, %123, %124 : vector<16x32xi32>
    %cst_62 = arith.constant 0.000000e+00 : f32
    %126 = vector.broadcast %cst_62 : f32 to vector<16x32xf32>
    %127 = arith.select %125, %122, %126 : vector<16x32xi1>, vector<16x32xf32>
    %128 = tpu.concatenate %121, %113, %127 in 1 : vector<16x32xf32>, vector<16x32xf32>, vector<16x32xf32> -> vector<16x96xf32>
    %129 = arith.truncf %128 : vector<16x96xf32> to vector<16x96xbf16>
    %cst_63 = arith.constant dense<0.000000e+00> : vector<16x32xf32>
    %130 = tpu.matmul %129, %114, %cst_63 {dimension_numbers = #tpu.dot_dimension_numbers<[1], [0], [0], [1], [0, 0, 1, 1], [], []>} : vector<16x96xbf16>, vector<96x32xbf16>, vector<16x32xf32> -> vector<16x32xf32>
    %131 = vector.broadcast %115 : vector<1x32xf32> to vector<16x32xf32>
    %132 = arith.addf %130, %131 : vector<16x32xf32>
    %133 = arith.addf %132, %78 : vector<16x32xf32>
    %cst_64 = arith.constant 5.000000e-01 : f32
    %134 = vector.broadcast %cst_64 : f32 to vector<16x32xf32>
    %135 = arith.mulf %134, %133 : vector<16x32xf32>
    %cst_65 = arith.constant 0.707106769 : f32
    %136 = vector.broadcast %cst_65 : f32 to vector<16x32xf32>
    %137 = arith.mulf %133, %136 : vector<16x32xf32>
    %138 = math.erf %137 : vector<16x32xf32>
    %cst_66 = arith.constant 1.000000e+00 : f32
    %139 = vector.broadcast %cst_66 : f32 to vector<16x32xf32>
    %140 = arith.addf %139, %138 : vector<16x32xf32>
    %141 = arith.mulf %135, %140 : vector<16x32xf32>
    %c0_67 = arith.constant 0 : index
    %c0_68 = arith.constant 0 : index
    %142 = vector.load %arg12[%c0_67, %c0_68] : memref<96x32xbf16, #tpu.memory_space<vmem>>, vector<96x32xbf16>
    %c0_69 = arith.constant 0 : index
    %c0_70 = arith.constant 0 : index
    %143 = vector.load %arg13[%c0_69, %c0_70] : memref<1x32xf32, #tpu.memory_space<vmem>>, vector<1x32xf32>
    %c4_i32 = arith.constant 4 : i32
    %144 = tpu.dynamic_rotate %141 by %c4_i32 dim 0 : vector<16x32xf32>, i32 -> vector<16x32xf32>
    %145 = tpu.iota {dimensions = array<i32: 0>} : vector<16x32xi32>
    %c4_i32_71 = arith.constant 4 : i32
    %146 = vector.broadcast %c4_i32_71 : i32 to vector<16x32xi32>
    %147 = arith.cmpi sge, %145, %146 : vector<16x32xi32>
    %cst_72 = arith.constant 0.000000e+00 : f32
    %148 = vector.broadcast %cst_72 : f32 to vector<16x32xf32>
    %149 = arith.select %147, %144, %148 : vector<16x32xi1>, vector<16x32xf32>
    %c12_i32 = arith.constant 12 : i32
    %150 = tpu.dynamic_rotate %141 by %c12_i32 dim 0 : vector<16x32xf32>, i32 -> vector<16x32xf32>
    %151 = tpu.iota {dimensions = array<i32: 0>} : vector<16x32xi32>
    %c12_i32_73 = arith.constant 12 : i32
    %152 = vector.broadcast %c12_i32_73 : i32 to vector<16x32xi32>
    %153 = arith.cmpi slt, %151, %152 : vector<16x32xi32>
    %cst_74 = arith.constant 0.000000e+00 : f32
    %154 = vector.broadcast %cst_74 : f32 to vector<16x32xf32>
    %155 = arith.select %153, %150, %154 : vector<16x32xi1>, vector<16x32xf32>
    %156 = tpu.concatenate %149, %141, %155 in 1 : vector<16x32xf32>, vector<16x32xf32>, vector<16x32xf32> -> vector<16x96xf32>
    %157 = arith.truncf %156 : vector<16x96xf32> to vector<16x96xbf16>
    %cst_75 = arith.constant dense<0.000000e+00> : vector<16x32xf32>
    %158 = tpu.matmul %157, %142, %cst_75 {dimension_numbers = #tpu.dot_dimension_numbers<[1], [0], [0], [1], [0, 0, 1, 1], [], []>} : vector<16x96xbf16>, vector<96x32xbf16>, vector<16x32xf32> -> vector<16x32xf32>
    %159 = vector.broadcast %143 : vector<1x32xf32> to vector<16x32xf32>
    %160 = arith.addf %158, %159 : vector<16x32xf32>
    %cst_76 = arith.constant 5.000000e-01 : f32
    %161 = vector.broadcast %cst_76 : f32 to vector<16x32xf32>
    %162 = arith.mulf %161, %160 : vector<16x32xf32>
    %cst_77 = arith.constant 0.707106769 : f32
    %163 = vector.broadcast %cst_77 : f32 to vector<16x32xf32>
    %164 = arith.mulf %160, %163 : vector<16x32xf32>
    %165 = math.erf %164 : vector<16x32xf32>
    %cst_78 = arith.constant 1.000000e+00 : f32
    %166 = vector.broadcast %cst_78 : f32 to vector<16x32xf32>
    %167 = arith.addf %166, %165 : vector<16x32xf32>
    %168 = arith.mulf %162, %167 : vector<16x32xf32>
    %c0_79 = arith.constant 0 : index
    %c0_80 = arith.constant 0 : index
    %169 = vector.load %arg14[%c0_79, %c0_80] : memref<96x32xbf16, #tpu.memory_space<vmem>>, vector<96x32xbf16>
    %c0_81 = arith.constant 0 : index
    %c0_82 = arith.constant 0 : index
    %170 = vector.load %arg15[%c0_81, %c0_82] : memref<1x32xf32, #tpu.memory_space<vmem>>, vector<1x32xf32>
    %c4_i32_83 = arith.constant 4 : i32
    %171 = tpu.dynamic_rotate %168 by %c4_i32_83 dim 0 : vector<16x32xf32>, i32 -> vector<16x32xf32>
    %172 = tpu.iota {dimensions = array<i32: 0>} : vector<16x32xi32>
    %c4_i32_84 = arith.constant 4 : i32
    %173 = vector.broadcast %c4_i32_84 : i32 to vector<16x32xi32>
    %174 = arith.cmpi sge, %172, %173 : vector<16x32xi32>
    %cst_85 = arith.constant 0.000000e+00 : f32
    %175 = vector.broadcast %cst_85 : f32 to vector<16x32xf32>
    %176 = arith.select %174, %171, %175 : vector<16x32xi1>, vector<16x32xf32>
    %c12_i32_86 = arith.constant 12 : i32
    %177 = tpu.dynamic_rotate %168 by %c12_i32_86 dim 0 : vector<16x32xf32>, i32 -> vector<16x32xf32>
    %178 = tpu.iota {dimensions = array<i32: 0>} : vector<16x32xi32>
    %c12_i32_87 = arith.constant 12 : i32
    %179 = vector.broadcast %c12_i32_87 : i32 to vector<16x32xi32>
    %180 = arith.cmpi slt, %178, %179 : vector<16x32xi32>
    %cst_88 = arith.constant 0.000000e+00 : f32
    %181 = vector.broadcast %cst_88 : f32 to vector<16x32xf32>
    %182 = arith.select %180, %177, %181 : vector<16x32xi1>, vector<16x32xf32>
    %183 = tpu.concatenate %176, %168, %182 in 1 : vector<16x32xf32>, vector<16x32xf32>, vector<16x32xf32> -> vector<16x96xf32>
    %184 = arith.truncf %183 : vector<16x96xf32> to vector<16x96xbf16>
    %cst_89 = arith.constant dense<0.000000e+00> : vector<16x32xf32>
    %185 = tpu.matmul %184, %169, %cst_89 {dimension_numbers = #tpu.dot_dimension_numbers<[1], [0], [0], [1], [0, 0, 1, 1], [], []>} : vector<16x96xbf16>, vector<96x32xbf16>, vector<16x32xf32> -> vector<16x32xf32>
    %186 = vector.broadcast %170 : vector<1x32xf32> to vector<16x32xf32>
    %187 = arith.addf %185, %186 : vector<16x32xf32>
    %188 = arith.addf %187, %133 : vector<16x32xf32>
    %189 = arith.truncf %188 : vector<16x32xf32> to vector<16x32xbf16>
    %c0_90 = arith.constant 0 : index
    %c0_91 = arith.constant 0 : index
    %190 = vector.load %arg20[%c0_90, %c0_91] : memref<32x16xbf16, #tpu.memory_space<vmem>>, vector<32x16xbf16>
    %cst_92 = arith.constant dense<0.000000e+00> : vector<16x16xf32>
    %191 = tpu.matmul %189, %190, %cst_92 {dimension_numbers = #tpu.dot_dimension_numbers<[1], [0], [0], [1], [0, 0, 1, 1], [], []>} : vector<16x32xbf16>, vector<32x16xbf16>, vector<16x16xf32> -> vector<16x16xf32>
    %c0_93 = arith.constant 0 : index
    %c0_94 = arith.constant 0 : index
    %192 = vector.load %arg21[%c0_93, %c0_94] : memref<1x16xf32, #tpu.memory_space<vmem>>, vector<1x16xf32>
    %193 = vector.broadcast %192 : vector<1x16xf32> to vector<16x16xf32>
    %194 = arith.addf %191, %193 : vector<16x16xf32>
    %cst_95 = arith.constant 5.000000e-01 : f32
    %195 = vector.broadcast %cst_95 : f32 to vector<16x32xf32>
    %196 = arith.mulf %195, %188 : vector<16x32xf32>
    %cst_96 = arith.constant 0.707106769 : f32
    %197 = vector.broadcast %cst_96 : f32 to vector<16x32xf32>
    %198 = arith.mulf %188, %197 : vector<16x32xf32>
    %199 = math.erf %198 : vector<16x32xf32>
    %cst_97 = arith.constant 1.000000e+00 : f32
    %200 = vector.broadcast %cst_97 : f32 to vector<16x32xf32>
    %201 = arith.addf %200, %199 : vector<16x32xf32>
    %202 = arith.mulf %196, %201 : vector<16x32xf32>
    %c0_98 = arith.constant 0 : index
    %c0_99 = arith.constant 0 : index
    %203 = vector.load %arg16[%c0_98, %c0_99] : memref<96x16xbf16, #tpu.memory_space<vmem>>, vector<96x16xbf16>
    %c0_100 = arith.constant 0 : index
    %c0_101 = arith.constant 0 : index
    %204 = vector.load %arg17[%c0_100, %c0_101] : memref<1x16xf32, #tpu.memory_space<vmem>>, vector<1x16xf32>
    %c8_i32 = arith.constant 8 : i32
    %205 = tpu.dynamic_rotate %202 by %c8_i32 dim 0 : vector<16x32xf32>, i32 -> vector<16x32xf32>
    %206 = tpu.iota {dimensions = array<i32: 0>} : vector<16x32xi32>
    %c8_i32_102 = arith.constant 8 : i32
    %207 = vector.broadcast %c8_i32_102 : i32 to vector<16x32xi32>
    %208 = arith.cmpi sge, %206, %207 : vector<16x32xi32>
    %cst_103 = arith.constant 0.000000e+00 : f32
    %209 = vector.broadcast %cst_103 : f32 to vector<16x32xf32>
    %210 = arith.select %208, %205, %209 : vector<16x32xi1>, vector<16x32xf32>
    %c8_i32_104 = arith.constant 8 : i32
    %211 = tpu.dynamic_rotate %202 by %c8_i32_104 dim 0 : vector<16x32xf32>, i32 -> vector<16x32xf32>
    %212 = tpu.iota {dimensions = array<i32: 0>} : vector<16x32xi32>
    %c8_i32_105 = arith.constant 8 : i32
    %213 = vector.broadcast %c8_i32_105 : i32 to vector<16x32xi32>
    %214 = arith.cmpi slt, %212, %213 : vector<16x32xi32>
    %cst_106 = arith.constant 0.000000e+00 : f32
    %215 = vector.broadcast %cst_106 : f32 to vector<16x32xf32>
    %216 = arith.select %214, %211, %215 : vector<16x32xi1>, vector<16x32xf32>
    %217 = tpu.concatenate %210, %202, %216 in 1 : vector<16x32xf32>, vector<16x32xf32>, vector<16x32xf32> -> vector<16x96xf32>
    %218 = arith.truncf %217 : vector<16x96xf32> to vector<16x96xbf16>
    %cst_107 = arith.constant dense<0.000000e+00> : vector<16x16xf32>
    %219 = tpu.matmul %218, %203, %cst_107 {dimension_numbers = #tpu.dot_dimension_numbers<[1], [0], [0], [1], [0, 0, 1, 1], [], []>} : vector<16x96xbf16>, vector<96x16xbf16>, vector<16x16xf32> -> vector<16x16xf32>
    %220 = vector.broadcast %204 : vector<1x16xf32> to vector<16x16xf32>
    %221 = arith.addf %219, %220 : vector<16x16xf32>
    %cst_108 = arith.constant 5.000000e-01 : f32
    %222 = vector.broadcast %cst_108 : f32 to vector<16x16xf32>
    %223 = arith.mulf %222, %221 : vector<16x16xf32>
    %cst_109 = arith.constant 0.707106769 : f32
    %224 = vector.broadcast %cst_109 : f32 to vector<16x16xf32>
    %225 = arith.mulf %221, %224 : vector<16x16xf32>
    %226 = math.erf %225 : vector<16x16xf32>
    %cst_110 = arith.constant 1.000000e+00 : f32
    %227 = vector.broadcast %cst_110 : f32 to vector<16x16xf32>
    %228 = arith.addf %227, %226 : vector<16x16xf32>
    %229 = arith.mulf %223, %228 : vector<16x16xf32>
    %c0_111 = arith.constant 0 : index
    %c0_112 = arith.constant 0 : index
    %230 = vector.load %arg18[%c0_111, %c0_112] : memref<48x16xbf16, #tpu.memory_space<vmem>>, vector<48x16xbf16>
    %c0_113 = arith.constant 0 : index
    %c0_114 = arith.constant 0 : index
    %231 = vector.load %arg19[%c0_113, %c0_114] : memref<1x16xf32, #tpu.memory_space<vmem>>, vector<1x16xf32>
    %c8_i32_115 = arith.constant 8 : i32
    %232 = tpu.dynamic_rotate %229 by %c8_i32_115 dim 0 : vector<16x16xf32>, i32 -> vector<16x16xf32>
    %233 = tpu.iota {dimensions = array<i32: 0>} : vector<16x16xi32>
    %c8_i32_116 = arith.constant 8 : i32
    %234 = vector.broadcast %c8_i32_116 : i32 to vector<16x16xi32>
    %235 = arith.cmpi sge, %233, %234 : vector<16x16xi32>
    %cst_117 = arith.constant 0.000000e+00 : f32
    %236 = vector.broadcast %cst_117 : f32 to vector<16x16xf32>
    %237 = arith.select %235, %232, %236 : vector<16x16xi1>, vector<16x16xf32>
    %c8_i32_118 = arith.constant 8 : i32
    %238 = tpu.dynamic_rotate %229 by %c8_i32_118 dim 0 : vector<16x16xf32>, i32 -> vector<16x16xf32>
    %239 = tpu.iota {dimensions = array<i32: 0>} : vector<16x16xi32>
    %c8_i32_119 = arith.constant 8 : i32
    %240 = vector.broadcast %c8_i32_119 : i32 to vector<16x16xi32>
    %241 = arith.cmpi slt, %239, %240 : vector<16x16xi32>
    %cst_120 = arith.constant 0.000000e+00 : f32
    %242 = vector.broadcast %cst_120 : f32 to vector<16x16xf32>
    %243 = arith.select %241, %238, %242 : vector<16x16xi1>, vector<16x16xf32>
    %244 = tpu.concatenate %237, %229, %243 in 1 : vector<16x16xf32>, vector<16x16xf32>, vector<16x16xf32> -> vector<16x48xf32>
    %245 = arith.truncf %244 : vector<16x48xf32> to vector<16x48xbf16>
    %cst_121 = arith.constant dense<0.000000e+00> : vector<16x16xf32>
    %246 = tpu.matmul %245, %230, %cst_121 {dimension_numbers = #tpu.dot_dimension_numbers<[1], [0], [0], [1], [0, 0, 1, 1], [], []>} : vector<16x48xbf16>, vector<48x16xbf16>, vector<16x16xf32> -> vector<16x16xf32>
    %247 = vector.broadcast %231 : vector<1x16xf32> to vector<16x16xf32>
    %248 = arith.addf %246, %247 : vector<16x16xf32>
    %249 = arith.addf %248, %194 : vector<16x16xf32>
    %c0_122 = arith.constant 0 : index
    %c0_123 = arith.constant 0 : index
    %c0_124 = arith.constant 0 : index
    %250 = vector.load %arg22[%c0_122, %c0_123, %c0_124] : memref<1x16x16xf32, #tpu.memory_space<vmem>>, vector<1x16x16xf32>
    %251 = vector.shape_cast %250 : vector<1x16x16xf32> to vector<16x16xf32>
    %252 = vector.shape_cast %249 : vector<16x16xf32> to vector<1x16x16xf32>
    tpu.vector_store %arg22[%c0_122, %c0_123, %c0_124], %252 {strides = array<i32>} : memref<1x16x16xf32, #tpu.memory_space<vmem>>, vector<1x16x16xf32>,
    return
  }
  func.func @transform_0(%arg0: i32) -> (i32, i32, i32) {
    %c0_i32 = arith.constant 0 : i32
    %c0_i32_0 = arith.constant 0 : i32
    %c0_i32_1 = arith.constant 0 : i32
    return %arg0, %c0_i32, %c0_i32_0 : i32, i32, i32
  }
  func.func @transform_1(%arg0: i32) -> (i32, i32) {
    %c0_i32 = arith.constant 0 : i32
    %c0_i32_0 = arith.constant 0 : i32
    %c0_i32_1 = arith.constant 0 : i32
    return %c0_i32, %c0_i32_0 : i32, i32
  }
  func.func @transform_2(%arg0: i32) -> (i32, i32) {
    %c0_i32 = arith.constant 0 : i32
    %c0_i32_0 = arith.constant 0 : i32
    %c0_i32_1 = arith.constant 0 : i32
    return %c0_i32, %c0_i32_0 : i32, i32
  }
  func.func @transform_3(%arg0: i32) -> (i32, i32) {
    %c0_i32 = arith.constant 0 : i32
    %c0_i32_0 = arith.constant 0 : i32
    %c0_i32_1 = arith.constant 0 : i32
    return %c0_i32, %c0_i32_0 : i32, i32
  }
  func.func @transform_4(%arg0: i32) -> (i32, i32) {
    %c0_i32 = arith.constant 0 : i32
    %c0_i32_0 = arith.constant 0 : i32
    %c0_i32_1 = arith.constant 0 : i32
    return %c0_i32, %c0_i32_0 : i32, i32
  }
  func.func @transform_5(%arg0: i32) -> (i32, i32) {
    %c0_i32 = arith.constant 0 : i32
    %c0_i32_0 = arith.constant 0 : i32
    %c0_i32_1 = arith.constant 0 : i32
    return %c0_i32, %c0_i32_0 : i32, i32
  }
  func.func @transform_6(%arg0: i32) -> (i32, i32) {
    %c0_i32 = arith.constant 0 : i32
    %c0_i32_0 = arith.constant 0 : i32
    %c0_i32_1 = arith.constant 0 : i32
    return %c0_i32, %c0_i32_0 : i32, i32
  }
  func.func @transform_7(%arg0: i32) -> (i32, i32) {
    %c0_i32 = arith.constant 0 : i32
    %c0_i32_0 = arith.constant 0 : i32
    %c0_i32_1 = arith.constant 0 : i32
    return %c0_i32, %c0_i32_0 : i32, i32
  }
  func.func @transform_8(%arg0: i32) -> (i32, i32) {
    %c0_i32 = arith.constant 0 : i32
    %c0_i32_0 = arith.constant 0 : i32
    %c0_i32_1 = arith.constant 0 : i32
    return %c0_i32, %c0_i32_0 : i32, i32
  }
  func.func @transform_9(%arg0: i32) -> (i32, i32) {
    %c0_i32 = arith.constant 0 : i32
    %c0_i32_0 = arith.constant 0 : i32
    %c0_i32_1 = arith.constant 0 : i32
    return %c0_i32, %c0_i32_0 : i32, i32
  }
  func.func @transform_10(%arg0: i32) -> (i32, i32) {
    %c0_i32 = arith.constant 0 : i32
    %c0_i32_0 = arith.constant 0 : i32
    %c0_i32_1 = arith.constant 0 : i32
    return %c0_i32, %c0_i32_0 : i32, i32
  }
  func.func @transform_11(%arg0: i32) -> (i32, i32) {
    %c0_i32 = arith.constant 0 : i32
    %c0_i32_0 = arith.constant 0 : i32
    %c0_i32_1 = arith.constant 0 : i32
    return %c0_i32, %c0_i32_0 : i32, i32
  }
  func.func @transform_12(%arg0: i32) -> (i32, i32) {
    %c0_i32 = arith.constant 0 : i32
    %c0_i32_0 = arith.constant 0 : i32
    %c0_i32_1 = arith.constant 0 : i32
    return %c0_i32, %c0_i32_0 : i32, i32
  }
  func.func @transform_13(%arg0: i32) -> (i32, i32) {
    %c0_i32 = arith.constant 0 : i32
    %c0_i32_0 = arith.constant 0 : i32
    %c0_i32_1 = arith.constant 0 : i32
    return %c0_i32, %c0_i32_0 : i32, i32
  }
  func.func @transform_14(%arg0: i32) -> (i32, i32) {
    %c0_i32 = arith.constant 0 : i32
    %c0_i32_0 = arith.constant 0 : i32
    %c0_i32_1 = arith.constant 0 : i32
    return %c0_i32, %c0_i32_0 : i32, i32
  }
  func.func @transform_15(%arg0: i32) -> (i32, i32) {
    %c0_i32 = arith.constant 0 : i32
    %c0_i32_0 = arith.constant 0 : i32
    %c0_i32_1 = arith.constant 0 : i32
    return %c0_i32, %c0_i32_0 : i32, i32
  }
  func.func @transform_16(%arg0: i32) -> (i32, i32) {
    %c0_i32 = arith.constant 0 : i32
    %c0_i32_0 = arith.constant 0 : i32
    %c0_i32_1 = arith.constant 0 : i32
    return %c0_i32, %c0_i32_0 : i32, i32
  }
  func.func @transform_17(%arg0: i32) -> (i32, i32) {
    %c0_i32 = arith.constant 0 : i32
    %c0_i32_0 = arith.constant 0 : i32
    %c0_i32_1 = arith.constant 0 : i32
    return %c0_i32, %c0_i32_0 : i32, i32
  }
  func.func @transform_18(%arg0: i32) -> (i32, i32) {
    %c0_i32 = arith.constant 0 : i32
    %c0_i32_0 = arith.constant 0 : i32
    %c0_i32_1 = arith.constant 0 : i32
    return %c0_i32, %c0_i32_0 : i32, i32
  }
  func.func @transform_19(%arg0: i32) -> (i32, i32) {
    %c0_i32 = arith.constant 0 : i32
    %c0_i32_0 = arith.constant 0 : i32
    %c0_i32_1 = arith.constant 0 : i32
    return %c0_i32, %c0_i32_0 : i32, i32
  }
  func.func @transform_20(%arg0: i32) -> (i32, i32) {
    %c0_i32 = arith.constant 0 : i32
    %c0_i32_0 = arith.constant 0 : i32
    %c0_i32_1 = arith.constant 0 : i32
    return %c0_i32, %c0_i32_0 : i32, i32
  }
  func.func @transform_21(%arg0: i32) -> (i32, i32, i32) {
    %c0_i32 = arith.constant 0 : i32
    %c0_i32_0 = arith.constant 0 : i32
    %c0_i32_1 = arith.constant 0 : i32
    return %arg0, %c0_i32, %c0_i32_0 : i32, i32, i32
  }
}

</mosaic_0001>

<bundles_post_ra>
// kernel: tpu_custom_call.1
= control target key start
LH: loop header
LB: loop body
LE: loop exit
PB: predicated region body
PF: predicated region fallthrough
CT: control target
= control target key end

     0   :  { %s3498_s0 = inlined_call_operand.vmem [shape: f32[2,16,4], index: 0, kind: input, shape index: {}]   ;;  %s3499_s1 = inlined_call_operand.vmem [shape: bf16[4,32], index: 1, kind: input, shape index: {}]   ;;  %s3500_s2 = inlined_call_operand.vmem [shape: f32[1,32], index: 2, kind: input, shape index: {}]   ;;  %s3501_s3 = inlined_call_operand.vmem [shape: bf16[96,32], index: 3, kind: input, shape index: {}]   ;;  %s3502_s4 = inlined_call_operand.vmem [shape: f32[1,32], index: 4, kind: input, shape index: {}]   ;;  %s3503_s5 = inlined_call_operand.vmem [shape: bf16[96,32], index: 5, kind: input, shape index: {}]   ;;  %s3504_s6 = inlined_call_operand.vmem [shape: f32[1,32], index: 6, kind: input, shape index: {}]   ;;  %s3505_s7 = inlined_call_operand.vmem [shape: bf16[96,32], index: 7, kind: input, shape index: {}]   ;;  %s3506_s8 = inlined_call_operand.vmem [shape: f32[1,32], index: 8, kind: input, shape index: {}]   ;;  %s3507_s9 = inlined_call_operand.vmem [shape: bf16[96,32], index: 9, kind: input, shape index: {}]   ;;  %s3508_s10 = inlined_call_operand.vmem [shape: f32[1,32], index: 10, kind: input, shape index: {}]   ;;  %s3509_s11 = inlined_call_operand.vmem [shape: bf16[96,32], index: 11, kind: input, shape index: {}]   ;;  %s3510_s12 = inlined_call_operand.vmem [shape: f32[1,32], index: 12, kind: input, shape index: {}]   ;;  %s3511_s13 = inlined_call_operand.vmem [shape: bf16[96,32], index: 13, kind: input, shape index: {}]   ;;  %s3512_s14 = inlined_call_operand.vmem [shape: f32[1,32], index: 14, kind: input, shape index: {}]   ;;  %s3513_s15 = inlined_call_operand.vmem [shape: bf16[96,16], index: 15, kind: input, shape index: {}]   ;;  %s3514_s16 = inlined_call_operand.vmem [shape: f32[1,16], index: 16, kind: input, shape index: {}]   ;;  %s3515_s17 = inlined_call_operand.vmem [shape: bf16[48,16], index: 17, kind: input, shape index: {}]   ;;  %s3516_s18 = inlined_call_operand.vmem [shape: f32[1,16], index: 18, kind: input, shape index: {}]   ;;  %s3517_s19 = inlined_call_operand.vmem [shape: bf16[32,16], index: 19, kind: input, shape index: {}]   ;;  %s3518_s20 = inlined_call_operand.vmem [shape: f32[1,16], index: 20, kind: input, shape index: {}]   ;;  %s3519_s21 = inlined_call_operand.hbm [shape: f32[2,16,16], index: 21, kind: output, shape index: {}]  }
   0x1   :  { %3530 = sst [smem:[#allocation8_spill]] %s3498_s0 }
   0x2   :  { %3531 = sst [smem:[#allocation9_spill]] %s3499_s1 }
   0x3   :  { %3532 = sst [smem:[#allocation10_spill]] %s3500_s2 }
   0x4   :  { %3533 = sst [smem:[#allocation11_spill]] %s3501_s3 }
   0x5   :  { %3534 = sst [smem:[#allocation12_spill]] %s3502_s4 }
   0x6   :  { %3535 = sst [smem:[#allocation13_spill]] %s3503_s5 }
   0x7   :  { %3536 = sst [smem:[#allocation14_spill]] %s3504_s6 }
   0x8   :  { %3537 = sst [smem:[#allocation15_spill]] %s3505_s7 }
   0x9   :  { %3538 = sst [smem:[#allocation16_spill]] %s3506_s8 }
   0xa   :  { %3539 = sst [smem:[#allocation17_spill]] %s3507_s9 }
   0xb   :  { %26 = vsyncpa [#allocation3], 0 }
   0xc   :  { %28 = vsyncpa [#allocation3 + $0x1], 0  ;;  %s2955_s2 = smov 0   ;;  %s2957_s25 = smov 0  }
   0xd   :  { %s2959_s26 = smov 0   ;;  %s2961_s27 = smov 0  }
   0xe LB: > { %3540 = sst [smem:[#allocation5_spill]] %s2833_s26  ;;  %s2976_s3 = sadd.s32 4294967295, %s2837_s27   ;;  %s2837_s27 = sphi %s2961_s27, %s3557_s27   ;;  %s2833_s26 = sphi %s2959_s26, %s3559_s26   ;;  %s2829_s25 = sphi %s2957_s25, %s3561_s25   ;;  %s2825_s2 = sphi %s2955_s2, %s3560_s2  }
   0xf   : > { %s2333_s28 = sadd.s32 4294967294, %s2837_s27   ;;  %s2980_s29 = sadd.s32 1, %s2837_s27  }
  0x10   : > { %3541 = sst [smem:[#allocation6_spill]] %s2980_s29  ;;  %s487_s0 = sadd.s32 1, %s2833_s26 }
  0x11   : > { %s484_s4 = ssub.s32 %s2837_s27, %s2980_s29  ;;  %p497_p0 = scmp.ne.s32.totalorder %s2833_s26, %s2829_s25 }
  0x12   : > { %p485_p1 = scmp.eq.s32.totalorder %s484_s4, 0  ;;  %p498_p2 = scmp.eq.s32.totalorder %s2976_s3, 1 }
  0x13   : > { %p503_p3 = scmp.ne.s32.totalorder %s2829_s25, %s2825_s2  ;;  %p504_p4 = scmp.eq.s32.totalorder %s2333_s28, 1 }
  0x14   : > { %s2991_s30 = scalar_select %p485_p1, %s2833_s26, %s487_s0  }
  0x15   : > { %p2993_p5 = por %p498_p2, %p497_p0  ;;  %p2997_p6 = por %p504_p4, %p503_p3 }
  0x16   : > { %3542 = sst [smem:[#allocation7_spill]] %s2991_s30  ;;  %p2336_p7 = scmp.ge.s32.totalorder %s2837_s27, 1 }
  0x17   : > { %p590_p8 = scmp.lt.s32.totalorder %s2837_s27, 3 }
  0x19   : > { %p591_p9 = pnand %p2336_p7, %p590_p8 }
  0x1a   : > { %p650_p10 = scmp.lt.s32.totalorder (!%p591_p9), %s2976_s3, 1  ;;  %s3545_s0 = sld [smem:[#allocation8_spill]] (!%p591_p9) }
  0x1b   : > { %594 = sbr.rel (%p591_p9) target bundleno = 2823 (0xb07), region = 104  ;;  %s3546_s26 = sld [smem:[#allocation9_spill]] (!%p591_p9) }
  0x1c   : > { %s3547_s28 = sld [smem:[#allocation10_spill]] (!%p591_p9) }
  0x1d   : > { %s3550_s24 = sld [smem:[#allocation13_spill]] (!%p591_p9) }
  0x1e   : > { %s3552_s6 = sld [smem:[#allocation14_spill]] (!%p591_p9) }
  0x1f   : > { %s3553_s7 = sld [smem:[#allocation15_spill]] (!%p591_p9) }
  0x20   : > { %s651_s23 = scalar_select %p650_p10, %s2976_s3, 1  ;;  %vm662_vm0 = vcmask 31744   ;;  %v2839_v2 = vmov 0.0   ;;  %vm686_vm3 = vcmask 1041408  }
  0x21   : > { %v678_v7 = vld [vmem:[%s3546_s26] sm:$0x3]  ;;  %s3528_s26 = smov 64   ;;  %s3554_s8 = sld [smem:[#allocation16_spill]] }
  0x22   : > { %s2559_s1 = sshll.u32 %s651_s23, 4  ;;  %v688_v8 = vsel %vm686_vm3, %v678_v7, 0  ;;  %v2733_v14 = vld [vmem:[%s3547_s28] ss:$0 sm:$0xff]  ;;  %s3523_s28 = smov 32   ;;  %vm847_vm3 = vcmask 523264  }
  0x23   : > { %s654_s4 = scalar_lea.vmem %s3545_s0, %s2559_s1  ;;  %697 = vmatpush.bf16.msra.mxu0 %v688_v8  ;;  %s3548_s0 = sld [smem:[#allocation11_spill]] }
  0x24   : > { %v656_v0 = vld [vmem:[%s654_s4] sm:$0xff]  ;;  %v657_v1 = vld [vmem:[%s654_s4 + $0x8] sm:$0xff]  ;;  %s3549_s4 = sld [smem:[#allocation12_spill]]  ;;  %s3551_s1 = smov 32  }
  0x25   : > { %vm658_vm1 = vcmp.ne.f32.partialorder %v656_v0, %v656_v0  ;;  %vm659_vm2 = vcmp.ne.f32.partialorder %v657_v1, %v657_v1  ;;  %s3555_s9 = sld [smem:[#allocation17_spill]] }
  0x26   : > { %v660_v3 = vsel %vm658_vm1, 1.0, %v2839_v2  ;;  %v661_v5 = vsel %vm659_vm2, 1.0, %v2839_v2  ;;  %vm844_vm2 = vcmask 261120  }
  0x27   : > { %v663_v4 = vsel %vm662_vm0, %v660_v3, 0.0  ;;  %v666_v6 = vsel %vm662_vm0, %v661_v5, 0.0 }
  0x28   : > { %664 = vadd.xlane.f32.xlu0 %v663_v4 }
  0x29   : > { %v2565_v7 = vld [vmem:[%s3548_s0 + $0x28] sm:$0xff] }
  0x2a   : > { %896 = vmatpush.bf16.msra.mxu1 %v2565_v7 }
  0x30   : > { %667 = vadd.xlane.f32.xlu0 %v666_v6 }
  0x9b   : > { %v665_v9 = vpop.xlane.xlu0 %664 }
  0x9c   : > { %vm669_vm4 = vcmp.gt.f32.partialorder %v665_v9, 0.0 }
  0x9d   : > { %v675_v11 = vsel %vm669_vm4, 0.0, %v656_v0 }
  0xa3   : > { %v668_v10 = vpop.xlane.xlu0 %667 }
  0xa4   : > { %vm670_vm5 = vcmp.gt.f32.partialorder %v668_v10, 0.0  ;;  %v2564_v10 = vld [vmem:[%s3548_s0 + $0x20] sm:$0xff] }
  0xa5   : > { %v676_v12 = vsel %vm670_vm5, 0.0, %v657_v1  ;;  %897 = vmatpush.bf16.msra.mxu1 %v2564_v10 }
  0xa6   : > { %v677_v13 = vpack.c.bf16 %v676_v12, %v675_v11 }
  0xa8   : > { %2340 = vmatmul.msk.bf16.vlgmr.msra.gmra.mxu0 %vm662_vm0, %v677_v13 }
 0x125   : > { %v699_v15 = vpop.f32.mrf.mxu0 }
 0x126   : > { %v700_v16 = vadd.f32 %v2733_v14, %v699_v15 }
 0x128   : > { %v3018_v17 = vsel %vm669_vm4, 0.0, %v700_v16  ;;  %vm890_vm4 = vcmask 785408  }
 0x129   : > { %v3021_v18 = vmul.f32 0.70710677, %v3018_v17 }
 0x12b   : > { %v710_v19 = vmul.f32 %v3021_v18, %v3021_v18 }
 0x12d   : > { %v711_v20 = vmin.f32 %v710_v19, 16.0  ;;  %v701_v21 = vpop.f32.mrf.mxu0 }
 0x12e   : > { %v702_v22 = vadd.f32 %v2733_v14, %v701_v21  ;;  %v2563_v21 = vld [vmem:[%s3548_s0 + $0x18] sm:$0xff] }
 0x12f   : > { %v712_v23 = vmul.f32 2.1237322e-06, %v711_v20  ;;  %v723_v24 = vmul.f32 3.8918573e-05, %v711_v20  ;;  %898 = vmatpush.bf16.msra.mxu1 %v2563_v21 }
 0x130   : > { %v3026_v25 = vsel %vm670_vm5, 0.0, %v702_v22 }
 0x131   : > { %v713_v26 = vadd.f32 0.00028619796, %v712_v23  ;;  %v724_v27 = vadd.f32 0.001143296, %v723_v24  ;;  %v3029_v28 = vmul.f32 0.70710677, %v3026_v25 }
 0x133   : > { %v714_v29 = vmul.f32 %v713_v26, %v711_v20  ;;  %v725_v30 = vmul.f32 %v724_v27, %v711_v20  ;;  %v750_v31 = vmul.f32 %v3029_v28, %v3029_v28 }
 0x135   : > { %v726_v32 = vadd.f32 0.014752088, %v725_v30  ;;  %v715_v33 = vadd.f32 0.0036580483, %v714_v29  ;;  %v751_v34 = vmin.f32 %v750_v31, 16.0 }
 0x137   : > { %v727_v35 = vmul.f32 %v726_v32, %v711_v20  ;;  %v752_v36 = vmul.f32 2.1237322e-06, %v751_v34  ;;  %v763_v37 = vmul.f32 3.8918573e-05, %v751_v34  ;;  %v716_v39 = vmul.f32 %v715_v33, %v711_v20 }
 0x138   : > { %v809_v32 = vlaneseq }
 0x139   : > { %v728_v38 = vadd.f32 0.112945676, %v727_v35  ;;  %v753_v40 = vadd.f32 0.00028619796, %v752_v36  ;;  %v764_v41 = vadd.f32 0.001143296, %v763_v37 }
 0x13a   : > { %v717_v46 = vadd.f32 0.05243302, %v716_v39  ;;  %v706_v36 = vmul.f32 0.5, %v3018_v17 }
 0x13b   : > { %v729_v42 = vmul.f32 %v728_v38, %v711_v20  ;;  %v754_v43 = vmul.f32 %v753_v40, %v751_v34  ;;  %v765_v44 = vmul.f32 %v764_v41, %v751_v34  ;;  %v3045_v38 = vshrl.u32 %v809_v32, 7 }
 0x13c   : > { %v718_v52 = vmul.f32 %v717_v46, %v711_v20  ;;  %v707_v40 = vmul.f32 0.5, %v3026_v25 }
 0x13d   : > { %v730_v45 = vadd.f32 0.4994258, %v729_v42  ;;  %v766_v47 = vadd.f32 0.014752088, %v765_v44  ;;  %v755_v49 = vadd.f32 0.0036580483, %v754_v43 }
 0x13e   : > { %v719_v56 = vadd.f32 0.18741608, %v718_v52  ;;  %v3049_v43 = vadd.s32 8, %v3045_v38  ;;  %vm821_vm14 = vcmp.lt.s32.totalorder %v3045_v38, 7  ;;  %vm811_vm15 = vcmp.lt.s32.totalorder %v3045_v38, 1 }
 0x13f   : > { %v731_v48 = vmul.f32 %v730_v45, %v711_v20  ;;  %v767_v50 = vmul.f32 %v766_v47, %v751_v34  ;;  %v756_v54 = vmul.f32 %v755_v49, %v751_v34  ;;  %vm815_vm1 = vcmp.ge.s32.totalorder %v3045_v38, 1 }
 0x140   : > { %v720_v61 = vmul.f32 %v719_v56, %v711_v20  ;;  %vm825_vm0 = vcmp.lt.s32.totalorder %v3049_v43, 15  ;;  %v2560_v56 = vld [vmem:[%s3548_s0] sm:$0xff] }
 0x141   : > { %v732_v51 = vadd.f32 1.0, %v731_v48  ;;  %v768_v53 = vadd.f32 0.112945676, %v767_v50  ;;  %v757_v58 = vadd.f32 0.05243302, %v756_v54  ;;  %v2562_v54 = vld [vmem:[%s3548_s0 + $0x10] sm:$0xff] }
 0x142   : > { %v721_v3 = vadd.f32 1.1283791, %v720_v61  ;;  %899 = vmatpush.bf16.msra.mxu1 %v2562_v54 }
 0x143   : > { %2743 = vrcp.f32 %v732_v51  ;;  %v769_v55 = vmul.f32 %v768_v53, %v751_v34  ;;  %v758_v0 = vmul.f32 %v757_v58, %v751_v34  ;;  %v744_v2 = vand.u32 2147483648, %v732_v51 }
 0x144   : > { %v742_v5 = vand.u32 2147483647, %v732_v51  ;;  %vm738_vm7 = vweird.f32 %v732_v51  ;;  %v722_v12 = vmul.f32 %v721_v3, %v3021_v18 }
 0x145   : > { %v770_v57 = vadd.f32 0.4994258, %v769_v55  ;;  %v759_v6 = vadd.f32 0.18741608, %v758_v0  ;;  %v745_v9 = vor.u32 1.1754944e-38, %v744_v2  ;;  %v2561_v55 = vld [vmem:[%s3548_s0 + $0x8] sm:$0xff] }
 0x146   : > { %vm743_vm9 = vcmp.eq.f32.partialorder %v742_v5, 8.507059e+37  ;;  %900 = vmatpush.bf16.msra.mxu1 %v2561_v55  ;;  %v2734_v5 = vld [vmem:[%s3549_s4] ss:$0 sm:$0xff]  ;;  %s2607_s4 = sshll.u32 %s2976_s3, 4 }
 0x147   : > { %v771_v59 = vmul.f32 %v770_v57, %v751_v34  ;;  %v760_v15 = vmul.f32 %v759_v6, %v751_v34 }
 0x149   : > { %v2744_v60 = vpop.eup %2743  ;;  %v772_v63 = vadd.f32 1.0, %v771_v59  ;;  %v761_v23 = vadd.f32 1.1283791, %v760_v15 }
 0x14a   : > { %v734_v62 = vmul.f32 %v2744_v60, %v732_v51  ;;  %vm739_vm6 = vweird.f32 %v2744_v60  ;;  %901 = vmatpush.bf16.msra.mxu1 %v2560_v56 }
 0x14b   : > { %2745 = vrcp.f32 %v772_v63  ;;  %vm740_vm8 = vmor %vm738_vm7, %vm739_vm6  ;;  %v784_v22 = vand.u32 2147483648, %v772_v63  ;;  %v782_v26 = vand.u32 2147483647, %v772_v63  ;;  %vm778_vm11 = vweird.f32 %v772_v63 }
 0x14c   : > { %v735_v1 = vsub.f32 1.0, %v734_v62  ;;  %v762_v30 = vmul.f32 %v761_v23, %v3029_v28 }
 0x14d   : > { %v785_v18 = vor.u32 1.1754944e-38, %v784_v22  ;;  %vm783_vm13 = vcmp.eq.f32.partialorder %v782_v26, 8.507059e+37 }
 0x14e   : > { %v736_v4 = vmul.f32 %v2744_v60, %v735_v1 }
 0x150   : > { %v737_v8 = vadd.f32 %v2744_v60, %v736_v4 }
 0x151   : > { %v2746_v11 = vpop.eup %2745 }
 0x152   : > { %v741_v13 = vsel %vm740_vm8, %v2744_v60, %v737_v8  ;;  %v774_v16 = vmul.f32 %v2746_v11, %v772_v63  ;;  %vm779_vm10 = vweird.f32 %v2746_v11 }
 0x153   : > { %v746_v14 = vsel %vm743_vm9, %v745_v9, %v741_v13  ;;  %vm780_vm12 = vmor %vm778_vm11, %vm779_vm10 }
 0x154   : > { %v747_v19 = vmul.f32 %v746_v14, %v722_v12  ;;  %v775_v20 = vsub.f32 1.0, %v774_v16 }
 0x156   : > { %v776_v24 = vmul.f32 %v2746_v11, %v775_v20  ;;  %v2341_v27 = vclamps-f32 %v747_v19, 1.0 }
 0x158   : > { %v777_v29 = vadd.f32 %v2746_v11, %v776_v24  ;;  %v790_v34 = vadd.f32 1.0, %v2341_v27 }
 0x15a   : > { %v781_v31 = vsel %vm780_vm12, %v2746_v11, %v777_v29  ;;  %v792_v39 = vmul.f32 %v790_v34, %v706_v36 }
 0x15b   : > { %v786_v33 = vsel %vm783_vm13, %v785_v18, %v781_v31 }
 0x15c   : > { %v787_v35 = vmul.f32 %v786_v33, %v762_v30  ;;  %v807_v28 = vrot.slane %v792_v39, 7  ;;  %v819_v46 = vrot.slane %v792_v39, 1 }
 0x15e   : > { %v2342_v37 = vclamps-f32 %v787_v35, 1.0 }
 0x160   : > { %v791_v41 = vadd.f32 1.0, %v2342_v37 }
 0x162   : > { %v793_v42 = vmul.f32 %v791_v41, %v707_v40 }
 0x164   : > { %v808_v44 = vrot.slane %v793_v42, 7  ;;  %v2653_v45 = vpack.i.bf16 %v793_v42, %v792_v39  ;;  %v820_v47 = vrot.slane %v793_v42, 1 }
 0x166   : > { %2654 = vrot.lane.b32.xlu1 %v2653_v45, %s3523_s28  ;;  %v823_v48 = vsel %vm821_vm14, %v820_v47, %v819_v46  ;;  %v812_v49 = vsel %vm811_vm15, %v807_v28, %v808_v44  ;;  %v813_v50 = vsel %vm811_vm15, %v808_v44, %v807_v28  ;;  %v822_v51 = vsel %vm821_vm14, %v819_v46, %v820_v47 }
 0x167   : > { %v827_v52 = vsel %vm825_vm0, %v823_v48, 0.0  ;;  %v817_v61 = vsel %vm815_vm1, %v813_v50, 0.0 }
 0x168   : > { %v2658_v53 = vpack.i.bf16 %v827_v52, %v822_v51 }
 0x16e   : > { %2659 = vrot.lane.b32.xlu1 %v2658_v53, %s3528_s26 }
 0x1d8   : > { %v2655_v57 = vpop.permute.xlu1 %2654 }
 0x1d9   : > { %v2657_v58 = vunpack.i.h.bf16 %v2655_v57  ;;  %v2656_v59 = vunpack.i.l.bf16 %v2655_v57 }
 0x1db   : > { %v845_v0 = vsel %vm844_vm2, %v817_v61, %v2656_v59  ;;  %v846_v1 = vsel %vm844_vm2, %v812_v49, %v2657_v58 }
 0x1e0   : > { %v2660_v60 = vpop.permute.xlu1 %2659 }
 0x1e1   : > { %v2662_v62 = vunpack.i.h.bf16 %v2660_v60  ;;  %v2661_v63 = vunpack.i.l.bf16 %v2660_v60 }
 0x1e3   : > { %v848_v2 = vsel %vm847_vm3, %v845_v0, %v2661_v63  ;;  %v849_v3 = vsel %vm847_vm3, %v846_v1, %v2662_v62  ;;  %v2571_v0 = vld [vmem:[%s3550_s24 + $0x28] sm:$0xff] }
 0x1e4   : > { %v850_v4 = vpack.c.bf16 %v849_v3, %v848_v2  ;;  %1086 = vmatpush.bf16.msra.mxu2 %v2571_v0  ;;  %v2570_v3 = vld [vmem:[%s3550_s24 + $0x20] sm:$0xff] }
 0x1e6   : > { %2367 = vmatmul.msk.bf16.vlgmr.msra.gmra.mxu1 %vm890_vm4, %v850_v4 }
 0x1e8   : > { %1087 = vmatpush.bf16.msra.mxu2 %v2570_v3 }
 0x263   : > { %v903_v6 = vpop.f32.mrf.mxu1 }
 0x264   : > { %v3086_v7 = vadd.f32 %v2734_v5, %v903_v6 }
 0x266   : > { %v3089_v8 = vmul.f32 0.70710677, %v3086_v7 }
 0x268   : > { %v912_v9 = vmul.f32 %v3089_v8, %v3089_v8 }
 0x26a   : > { %v913_v10 = vmin.f32 %v912_v9, 16.0 }
 0x26b   : > { %v905_v11 = vpop.f32.mrf.mxu1 }
 0x26c   : > { %v914_v12 = vmul.f32 2.1237322e-06, %v913_v10  ;;  %v925_v13 = vmul.f32 3.8918573e-05, %v913_v10  ;;  %v3093_v14 = vadd.f32 %v2734_v5, %v905_v11 }
 0x26e   : > { %v915_v15 = vadd.f32 0.00028619796, %v914_v12  ;;  %v926_v16 = vadd.f32 0.001143296, %v925_v13  ;;  %v3096_v19 = vmul.f32 0.70710677, %v3093_v14 }
 0x270   : > { %v916_v20 = vmul.f32 %v915_v15, %v913_v10  ;;  %v927_v21 = vmul.f32 %v926_v16, %v913_v10  ;;  %v952_v22 = vmul.f32 %v3096_v19, %v3096_v19  ;;  %v2569_v15 = vld [vmem:[%s3550_s24 + $0x18] sm:$0xff] }
 0x271   : > { %1088 = vmatpush.bf16.msra.mxu2 %v2569_v15 }
 0x272   : > { %v928_v23 = vadd.f32 0.014752088, %v927_v21  ;;  %v917_v24 = vadd.f32 0.0036580483, %v916_v20  ;;  %v953_v26 = vmin.f32 %v952_v22, 16.0 }
 0x274   : > { %v929_v27 = vmul.f32 %v928_v23, %v913_v10  ;;  %v954_v29 = vmul.f32 2.1237322e-06, %v953_v26  ;;  %v965_v18 = vmul.f32 3.8918573e-05, %v953_v26  ;;  %v918_v31 = vmul.f32 %v917_v24, %v913_v10 }
 0x276   : > { %v930_v30 = vadd.f32 0.112945676, %v929_v27  ;;  %v955_v32 = vadd.f32 0.00028619796, %v954_v29  ;;  %v966_v33 = vadd.f32 0.001143296, %v965_v18 }
 0x277   : > { %v919_v39 = vadd.f32 0.05243302, %v918_v31  ;;  %v908_v31 = vmul.f32 0.5, %v3086_v7 }
 0x278   : > { %v931_v34 = vmul.f32 %v930_v30, %v913_v10  ;;  %v956_v35 = vmul.f32 %v955_v32, %v953_v26  ;;  %v967_v36 = vmul.f32 %v966_v33, %v953_v26 }
 0x279   : > { %v920_v45 = vmul.f32 %v919_v39, %v913_v10 }
 0x27a   : > { %v932_v37 = vadd.f32 0.4994258, %v931_v34  ;;  %v968_v40 = vadd.f32 0.014752088, %v967_v36  ;;  %v957_v42 = vadd.f32 0.0036580483, %v956_v35 }
 0x27b   : > { %v921_v49 = vadd.f32 0.18741608, %v920_v45  ;;  %v909_v34 = vmul.f32 0.5, %v3093_v14 }
 0x27c   : > { %v933_v41 = vmul.f32 %v932_v37, %v913_v10  ;;  %v969_v28 = vmul.f32 %v968_v40, %v953_v26  ;;  %v958_v47 = vmul.f32 %v957_v42, %v953_v26 }
 0x27d   : > { %v922_v54 = vmul.f32 %v921_v49, %v913_v10 }
 0x27e   : > { %v934_v44 = vadd.f32 1.0, %v933_v41  ;;  %v970_v46 = vadd.f32 0.112945676, %v969_v28  ;;  %v959_v51 = vadd.f32 0.05243302, %v958_v47  ;;  %v2567_v47 = vld [vmem:[%s3550_s24 + $0x8] sm:$0xff] }
 0x27f   : > { %v923_v60 = vadd.f32 1.1283791, %v922_v54 }
 0x280   : > { %2747 = vrcp.f32 %v934_v44  ;;  %v971_v48 = vmul.f32 %v970_v46, %v953_v26  ;;  %v960_v57 = vmul.f32 %v959_v51, %v953_v26  ;;  %v946_v59 = vand.u32 2147483648, %v934_v44  ;;  %v2568_v46 = vld [vmem:[%s3550_s24 + $0x10] sm:$0xff] }
 0x281   : > { %v944_v62 = vand.u32 2147483647, %v934_v44  ;;  %vm940_vm6 = vweird.f32 %v934_v44  ;;  %v924_v5 = vmul.f32 %v923_v60, %v3089_v8  ;;  %1089 = vmatpush.bf16.msra.mxu2 %v2568_v46 }
 0x282   : > { %v972_v50 = vadd.f32 0.4994258, %v971_v48  ;;  %v961_v63 = vadd.f32 0.18741608, %v960_v57  ;;  %v947_v2 = vor.u32 1.1754944e-38, %v946_v59  ;;  %v2566_v48 = vld [vmem:[%s3550_s24] sm:$0xff] }
 0x283   : > { %vm945_vm8 = vcmp.eq.f32.partialorder %v944_v62, 8.507059e+37 }
 0x284   : > { %v973_v52 = vmul.f32 %v972_v50, %v953_v26  ;;  %v962_v10 = vmul.f32 %v961_v63, %v953_v26 }
 0x285   : > { %1090 = vmatpush.bf16.msra.mxu2 %v2567_v47 }
 0x286   : > { %v2748_v53 = vpop.eup %2747  ;;  %v974_v56 = vadd.f32 1.0, %v973_v52  ;;  %v963_v20 = vadd.f32 1.1283791, %v962_v10 }
 0x287   : > { %v936_v55 = vmul.f32 %v2748_v53, %v934_v44  ;;  %vm941_vm5 = vweird.f32 %v2748_v53 }
 0x288   : > { %2749 = vrcp.f32 %v974_v56  ;;  %vm942_vm7 = vmor %vm940_vm6, %vm941_vm5  ;;  %v986_v16 = vand.u32 2147483648, %v974_v56  ;;  %v984_v22 = vand.u32 2147483647, %v974_v56  ;;  %vm980_vm10 = vweird.f32 %v974_v56 }
 0x289   : > { %v937_v58 = vsub.f32 1.0, %v936_v55  ;;  %v964_v26 = vmul.f32 %v963_v20, %v3096_v19  ;;  %1091 = vmatpush.bf16.msra.mxu2 %v2566_v48 }
 0x28a   : > { %v987_v8 = vor.u32 1.1754944e-38, %v986_v16  ;;  %vm985_vm12 = vcmp.eq.f32.partialorder %v984_v22, 8.507059e+37 }
 0x28b   : > { %v938_v61 = vmul.f32 %v2748_v53, %v937_v58 }
 0x28d   : > { %v939_v1 = vadd.f32 %v2748_v53, %v938_v61  ;;  %v2735_v61 = vld [vmem:[%s3552_s6] ss:$0 sm:$0xff] }
 0x28e   : > { %v2750_v4 = vpop.eup %2749 }
 0x28f   : > { %v943_v6 = vsel %vm942_vm7, %v2748_v53, %v939_v1  ;;  %v976_v11 = vmul.f32 %v2750_v4, %v974_v56  ;;  %vm981_vm9 = vweird.f32 %v2750_v4 }
 0x290   : > { %v948_v9 = vsel %vm945_vm8, %v947_v2, %v943_v6  ;;  %vm982_vm11 = vmor %vm980_vm10, %vm981_vm9  ;;  %vm1212_vm8 = vcmp.lt.s32.totalorder %v3045_v38, 6  ;;  %vm1216_vm9 = vcmp.lt.s32.totalorder %v3049_v43, 14  ;;  %vm1203_vm10 = vcmp.lt.s32.totalorder %v3045_v38, 2 }
 0x291   : > { %v949_v12 = vmul.f32 %v948_v9, %v924_v5  ;;  %v977_v13 = vsub.f32 1.0, %v976_v11 }
 0x293   : > { %v978_v21 = vmul.f32 %v2750_v4, %v977_v13  ;;  %v2368_v23 = vclamps-f32 %v949_v12, 1.0 }
 0x295   : > { %v979_v24 = vadd.f32 %v2750_v4, %v978_v21  ;;  %v992_v29 = vadd.f32 1.0, %v2368_v23 }
 0x297   : > { %v983_v27 = vsel %vm982_vm11, %v2750_v4, %v979_v24  ;;  %v994_v33 = vmul.f32 %v992_v29, %v908_v31  ;;  %vm1206_vm11 = vcmp.ge.s32.totalorder %v3045_v38, 2 }
 0x298   : > { %v988_v18 = vsel %vm985_vm12, %v987_v8, %v983_v27 }
 0x299   : > { %v989_v30 = vmul.f32 %v988_v18, %v964_v26  ;;  %v1009_v37 = vrot.slane %v994_v33, 7  ;;  %v1015_v39 = vrot.slane %v994_v33, 1 }
 0x29b   : > { %v2369_v32 = vclamps-f32 %v989_v30, 1.0 }
 0x29d   : > { %v993_v35 = vadd.f32 1.0, %v2369_v32 }
 0x29f   : > { %v995_v36 = vmul.f32 %v993_v35, %v909_v34 }
 0x2a1   : > { %v1010_v40 = vrot.slane %v995_v36, 7  ;;  %v1016_v41 = vrot.slane %v995_v36, 1  ;;  %v2663_v42 = vpack.i.bf16 %v995_v36, %v994_v33 }
 0x2a3   : > { %2664 = vrot.lane.b32.xlu2 %v2663_v42, %s3551_s1  ;;  %v1018_v19 = vsel %vm821_vm14, %v1016_v41, %v1015_v39  ;;  %v1011_v28 = vsel %vm811_vm15, %v1009_v37, %v1010_v40  ;;  %v1012_v7 = vsel %vm811_vm15, %v1010_v40, %v1009_v37  ;;  %v1017_v14 = vsel %vm821_vm14, %v1015_v39, %v1016_v41 }
 0x2a4   : > { %v1020_v44 = vsel %vm825_vm0, %v1018_v19, 0.0  ;;  %v1013_v53 = vsel %vm815_vm1, %v1012_v7, 0.0 }
 0x2a5   : > { %v2668_v45 = vpack.i.bf16 %v1020_v44, %v1017_v14 }
 0x2ab   : > { %2669 = vrot.lane.b32.xlu2 %v2668_v45, %s3528_s26 }
 0x2fd   : > { %v2665_v49 = vpop.permute.xlu2 %2664 }
 0x2fe   : > { %v2667_v50 = vunpack.i.h.bf16 %v2665_v49  ;;  %v2666_v51 = vunpack.i.l.bf16 %v2665_v49 }
 0x300   : > { %v1037_v56 = vsel %vm844_vm2, %v1013_v53, %v2666_v51  ;;  %v1038_v57 = vsel %vm844_vm2, %v1011_v28, %v2667_v50  ;;  %v2577_v50 = vld [vmem:[%s3553_s7 + $0x28] sm:$0xff]  ;;  %v2576_v53 = vld [vmem:[%s3553_s7 + $0x20] sm:$0xff] }
 0x301   : > { %1284 = vmatpush.bf16.msra.mxu3 %v2577_v50 }
 0x305   : > { %v2670_v52 = vpop.permute.xlu2 %2669  ;;  %1285 = vmatpush.bf16.msra.mxu3 %v2576_v53  ;;  %v2736_v53 = vld [vmem:[%s3554_s8] ss:$0 sm:$0xff]  ;;  %s3556_s8 = smov 64  }
 0x306   : > { %v2672_v54 = vunpack.i.h.bf16 %v2670_v52  ;;  %v2671_v55 = vunpack.i.l.bf16 %v2670_v52 }
 0x308   : > { %v1039_v58 = vsel %vm847_vm3, %v1037_v56, %v2671_v55  ;;  %v1040_v59 = vsel %vm847_vm3, %v1038_v57, %v2672_v54 }
 0x309   : > { %v1041_v60 = vpack.c.bf16 %v1040_v59, %v1039_v58 }
 0x30b   : > { %2394 = vmatmul.msk.bf16.vlgmr.msra.gmra.mxu2 %vm890_vm4, %v1041_v60  ;;  %v2575_v60 = vld [vmem:[%s3553_s7 + $0x18] sm:$0xff] }
 0x30c   : > { %1286 = vmatpush.bf16.msra.mxu3 %v2575_v60 }
 0x38e   : > { %v1093_v62 = vpop.f32.mrf.mxu2 }
 0x38f   : > { %v1094_v63 = vadd.f32 %v2735_v61, %v1093_v62 }
 0x391   : > { %v3145_v0 = vadd.f32 %v1094_v63, %v3018_v17 }
 0x393   : > { %v3148_v1 = vmul.f32 0.70710677, %v3145_v0 }
 0x395   : > { %v1104_v2 = vmul.f32 %v3148_v1, %v3148_v1 }
 0x396   : > { %v1095_v3 = vpop.f32.mrf.mxu2 }
 0x397   : > { %v1105_v4 = vmin.f32 %v1104_v2, 16.0  ;;  %v1096_v5 = vadd.f32 %v2735_v61, %v1095_v3 }
 0x399   : > { %v1106_v6 = vmul.f32 2.1237322e-06, %v1105_v4  ;;  %v1117_v9 = vmul.f32 3.8918573e-05, %v1105_v4  ;;  %v3153_v10 = vadd.f32 %v1096_v5, %v3026_v25 }
 0x39b   : > { %v1107_v11 = vadd.f32 0.00028619796, %v1106_v6  ;;  %v1118_v12 = vadd.f32 0.001143296, %v1117_v9  ;;  %v3156_v13 = vmul.f32 0.70710677, %v3153_v10 }
 0x39c   : > { %v2574_v9 = vld [vmem:[%s3553_s7 + $0x10] sm:$0xff] }
 0x39d   : > { %v1108_v17 = vmul.f32 %v1107_v11, %v1105_v4  ;;  %v1119_v15 = vmul.f32 %v1118_v12, %v1105_v4  ;;  %v1144_v16 = vmul.f32 %v3156_v13, %v3156_v13  ;;  %1287 = vmatpush.bf16.msra.mxu3 %v2574_v9 }
 0x39f   : > { %v1120_v20 = vadd.f32 0.014752088, %v1119_v15  ;;  %v1109_v21 = vadd.f32 0.0036580483, %v1108_v17  ;;  %v1145_v22 = vmin.f32 %v1144_v16, 16.0 }
 0x3a1   : > { %v1121_v23 = vmul.f32 %v1120_v20, %v1105_v4  ;;  %v1146_v24 = vmul.f32 2.1237322e-06, %v1145_v22  ;;  %v1157_v8 = vmul.f32 3.8918573e-05, %v1145_v22  ;;  %v1110_v27 = vmul.f32 %v1109_v21, %v1105_v4 }
 0x3a3   : > { %v1122_v26 = vadd.f32 0.112945676, %v1121_v23  ;;  %v1147_v25 = vadd.f32 0.00028619796, %v1146_v24  ;;  %v1158_v29 = vadd.f32 0.001143296, %v1157_v8 }
 0x3a4   : > { %v1111_v33 = vadd.f32 0.05243302, %v1110_v27 }
 0x3a5   : > { %v1123_v18 = vmul.f32 %v1122_v26, %v1105_v4  ;;  %v1148_v30 = vmul.f32 %v1147_v25, %v1145_v22  ;;  %v1159_v31 = vmul.f32 %v1158_v29, %v1145_v22  ;;  %v1100_v26 = vmul.f32 0.5, %v3145_v0 }
 0x3a6   : > { %v1112_v40 = vmul.f32 %v1111_v33, %v1105_v4  ;;  %v1101_v29 = vmul.f32 0.5, %v3153_v10 }
 0x3a7   : > { %v1124_v32 = vadd.f32 0.4994258, %v1123_v18  ;;  %v1160_v34 = vadd.f32 0.014752088, %v1159_v31  ;;  %v1149_v36 = vadd.f32 0.0036580483, %v1148_v30 }
 0x3a8   : > { %v1113_v28 = vadd.f32 0.18741608, %v1112_v40 }
 0x3a9   : > { %v1125_v35 = vmul.f32 %v1124_v32, %v1105_v4  ;;  %v1161_v37 = vmul.f32 %v1160_v34, %v1145_v22  ;;  %v1150_v42 = vmul.f32 %v1149_v36, %v1145_v22 }
 0x3aa   : > { %v1114_v46 = vmul.f32 %v1113_v28, %v1105_v4 }
 0x3ab   : > { %v1126_v39 = vadd.f32 1.0, %v1125_v35  ;;  %v1162_v41 = vadd.f32 0.112945676, %v1161_v37  ;;  %v1151_v14 = vadd.f32 0.05243302, %v1150_v42  ;;  %v2573_v42 = vld [vmem:[%s3553_s7 + $0x8] sm:$0xff] }
 0x3ac   : > { %v1115_v54 = vadd.f32 1.1283791, %v1114_v46  ;;  %1288 = vmatpush.bf16.msra.mxu3 %v2573_v42 }
 0x3ad   : > { %2751 = vrcp.f32 %v1126_v39  ;;  %v1163_v19 = vmul.f32 %v1162_v41, %v1145_v22  ;;  %v1152_v49 = vmul.f32 %v1151_v14, %v1145_v22  ;;  %v1138_v52 = vand.u32 2147483648, %v1126_v39 }
 0x3ae   : > { %v1136_v56 = vand.u32 2147483647, %v1126_v39  ;;  %vm1132_vm14 = vweird.f32 %v1126_v39  ;;  %v1116_v62 = vmul.f32 %v1115_v54, %v3148_v1 }
 0x3af   : > { %v1164_v7 = vadd.f32 0.4994258, %v1163_v19  ;;  %v1153_v57 = vadd.f32 0.18741608, %v1152_v49  ;;  %v1139_v59 = vor.u32 1.1754944e-38, %v1138_v52  ;;  %v2572_v19 = vld [vmem:[%s3553_s7] sm:$0xff] }
 0x3b0   : > { %vm1137_vm0 = vcmp.eq.f32.partialorder %v1136_v56, 8.507059e+37  ;;  %1289 = vmatpush.bf16.msra.mxu3 %v2572_v19  ;;  %s2842_s7 = smov 16  }
 0x3b1   : > { %v1165_v44 = vmul.f32 %v1164_v7, %v1145_v22  ;;  %v1154_v3 = vmul.f32 %v1153_v57, %v1145_v22 }
 0x3b3   : > { %v2752_v45 = vpop.eup %2751  ;;  %v1166_v48 = vadd.f32 1.0, %v1165_v44  ;;  %v1155_v12 = vadd.f32 1.1283791, %v1154_v3 }
 0x3b4   : > { %v1128_v47 = vmul.f32 %v2752_v45, %v1126_v39  ;;  %vm1133_vm13 = vweird.f32 %v2752_v45 }
 0x3b5   : > { %2753 = vrcp.f32 %v1166_v48  ;;  %vm1134_vm15 = vmor %vm1132_vm14, %vm1133_vm13  ;;  %v1178_v11 = vand.u32 2147483648, %v1166_v48  ;;  %v1176_v15 = vand.u32 2147483647, %v1166_v48  ;;  %vm1172_vm5 = vweird.f32 %v1166_v48 }
 0x3b6   : > { %v1129_v51 = vsub.f32 1.0, %v1128_v47  ;;  %v1156_v21 = vmul.f32 %v1155_v12, %v3156_v13 }
 0x3b7   : > { %v1179_v1 = vor.u32 1.1754944e-38, %v1178_v11  ;;  %vm1177_vm7 = vcmp.eq.f32.partialorder %v1176_v15, 8.507059e+37 }
 0x3b8   : > { %v1130_v55 = vmul.f32 %v2752_v45, %v1129_v51 }
 0x3ba   : > { %v1131_v58 = vadd.f32 %v2752_v45, %v1130_v55 }
 0x3bb   : > { %v2754_v61 = vpop.eup %2753 }
 0x3bc   : > { %v1135_v63 = vsel %vm1134_vm15, %v2752_v45, %v1131_v58  ;;  %v1168_v4 = vmul.f32 %v2754_v61, %v1166_v48  ;;  %vm1173_vm1 = vweird.f32 %v2754_v61 }
 0x3bd   : > { %v1140_v2 = vsel %vm1137_vm0, %v1139_v59, %v1135_v63  ;;  %vm1174_vm6 = vmor %vm1172_vm5, %vm1173_vm1 }
 0x3be   : > { %v1141_v5 = vmul.f32 %v1140_v2, %v1116_v62  ;;  %v1169_v6 = vsub.f32 1.0, %v1168_v4 }
 0x3c0   : > { %v1170_v17 = vmul.f32 %v2754_v61, %v1169_v6  ;;  %v2395_v16 = vclamps-f32 %v1141_v5, 1.0 }
 0x3c2   : > { %v1171_v20 = vadd.f32 %v2754_v61, %v1170_v17  ;;  %v1184_v24 = vadd.f32 1.0, %v2395_v16 }
 0x3c4   : > { %v1175_v22 = vsel %vm1174_vm6, %v2754_v61, %v1171_v20  ;;  %v1186_v25 = vmul.f32 %v1184_v24, %v1100_v26 }
 0x3c5   : > { %v1180_v23 = vsel %vm1177_vm7, %v1179_v1, %v1175_v22 }
 0x3c6   : > { %v1181_v8 = vmul.f32 %v1180_v23, %v1156_v21  ;;  %v1210_v31 = vrot.slane %v1186_v25, 2  ;;  %v1201_v34 = vrot.slane %v1186_v25, 6 }
 0x3c8   : > { %v2396_v27 = vclamps-f32 %v1181_v8, 1.0 }
 0x3ca   : > { %v1185_v18 = vadd.f32 1.0, %v2396_v27 }
 0x3cc   : > { %v1187_v30 = vmul.f32 %v1185_v18, %v1101_v29 }
 0x3ce   : > { %v2673_v13 = vpack.i.bf16 %v1187_v30, %v1186_v25  ;;  %v1211_v32 = vrot.slane %v1187_v30, 2  ;;  %v1202_v33 = vrot.slane %v1187_v30, 6 }
 0x3d0   : > { %2674 = vrot.lane.b32.xlu0 %v2673_v13, %s3551_s1  ;;  %v1213_v35 = vsel %vm1212_vm8, %v1210_v31, %v1211_v32  ;;  %v1214_v36 = vsel %vm1212_vm8, %v1211_v32, %v1210_v31  ;;  %v1204_v37 = vsel %vm1203_vm10, %v1201_v34, %v1202_v33  ;;  %v1205_v39 = vsel %vm1203_vm10, %v1202_v33, %v1201_v34 }
 0x3d1   : > { %v1218_v40 = vsel %vm1216_vm9, %v1214_v36, 0.0  ;;  %v1208_v45 = vsel %vm1206_vm11, %v1205_v39, 0.0 }
 0x3d2   : > { %v2678_v41 = vpack.i.bf16 %v1218_v40, %v1213_v35 }
 0x3d4   : > { %2679 = vrot.lane.b32.xlu1 %v2678_v41, %s3528_s26 }
 0x442   : > { %v2675_v28 = vpop.permute.xlu0 %2674 }
 0x443   : > { %v2677_v7 = vunpack.i.h.bf16 %v2675_v28  ;;  %v2676_v14 = vunpack.i.l.bf16 %v2675_v28 }
 0x445   : > { %v1235_v48 = vsel %vm844_vm2, %v1208_v45, %v2676_v14  ;;  %v1236_v49 = vsel %vm844_vm2, %v1204_v37, %v2677_v7 }
 0x446   : > { %v2680_v44 = vpop.permute.xlu1 %2679 }
 0x447   : > { %v2682_v46 = vunpack.i.h.bf16 %v2680_v44  ;;  %v2681_v47 = vunpack.i.l.bf16 %v2680_v44 }
 0x449   : > { %v1237_v50 = vsel %vm847_vm3, %v1235_v48, %v2681_v47  ;;  %v1238_v51 = vsel %vm847_vm3, %v1236_v49, %v2682_v46 }
 0x44a   : > { %v1239_v52 = vpack.c.bf16 %v1238_v51, %v1237_v50 }
 0x44c   : > { %2421 = vmatmul.msk.bf16.vlgmr.msra.gmra.mxu3 %vm890_vm4, %v1239_v52 }
 0x4cf   : > { %v1291_v54 = vpop.f32.mrf.mxu3 }
 0x4d0   : > { %v3208_v55 = vadd.f32 %v2736_v53, %v1291_v54 }
 0x4d2   : > { %v1298_v56 = vmul.f32 0.70710677, %v3208_v55 }
 0x4d4   : > { %v1300_v57 = vmul.f32 %v1298_v56, %v1298_v56 }
 0x4d6   : > { %v1301_v58 = vmin.f32 %v1300_v57, 16.0 }
 0x4d7   : > { %v1293_v59 = vpop.f32.mrf.mxu3 }
 0x4d8   : > { %v1302_v60 = vmul.f32 2.1237322e-06, %v1301_v58  ;;  %v1313_v61 = vmul.f32 3.8918573e-05, %v1301_v58  ;;  %v3211_v62 = vadd.f32 %v2736_v53, %v1293_v59 }
 0x4da   : > { %v1303_v63 = vadd.f32 0.00028619796, %v1302_v60  ;;  %v1314_v2 = vadd.f32 0.001143296, %v1313_v61  ;;  %v3214_v3 = vmul.f32 0.70710677, %v3211_v62 }
 0x4dc   : > { %v1304_v4 = vmul.f32 %v1303_v63, %v1301_v58  ;;  %v1315_v5 = vmul.f32 %v1314_v2, %v1301_v58  ;;  %v1340_v6 = vmul.f32 %v3214_v3, %v3214_v3 }
 0x4de   : > { %v1316_v9 = vadd.f32 0.014752088, %v1315_v5  ;;  %v1305_v11 = vadd.f32 0.0036580483, %v1304_v4  ;;  %v1341_v12 = vmin.f32 %v1340_v6, 16.0 }
 0x4e0   : > { %v1317_v17 = vmul.f32 %v1316_v9, %v1301_v58  ;;  %v1342_v15 = vmul.f32 2.1237322e-06, %v1341_v12  ;;  %v1353_v16 = vmul.f32 3.8918573e-05, %v1341_v12  ;;  %v1306_v1 = vmul.f32 %v1305_v11, %v1301_v58 }
 0x4e2   : > { %v1318_v20 = vadd.f32 0.112945676, %v1317_v17  ;;  %v1343_v21 = vadd.f32 0.00028619796, %v1342_v15  ;;  %v1354_v22 = vadd.f32 0.001143296, %v1353_v16 }
 0x4e3   : > { %v1307_v27 = vadd.f32 0.05243302, %v1306_v1  ;;  %v1296_v15 = vmul.f32 0.5, %v3208_v55  ;;  %v1297_v1 = vmul.f32 0.5, %v3211_v62 }
 0x4e4   : > { %v1319_v23 = vmul.f32 %v1318_v20, %v1301_v58  ;;  %v1344_v24 = vmul.f32 %v1343_v21, %v1341_v12  ;;  %v1355_v8 = vmul.f32 %v1354_v22, %v1341_v12 }
 0x4e5   : > { %v1308_v13 = vmul.f32 %v1307_v27, %v1301_v58 }
 0x4e6   : > { %v1320_v26 = vadd.f32 0.4994258, %v1319_v23  ;;  %v1356_v25 = vadd.f32 0.014752088, %v1355_v8  ;;  %v1345_v18 = vadd.f32 0.0036580483, %v1344_v24 }
 0x4e7   : > { %v1309_v35 = vadd.f32 0.18741608, %v1308_v13  ;;  %v2581_v13 = vld [vmem:[%s3555_s9 + $0x18] sm:$0xff] }
 0x4e8   : > { %v1321_v29 = vmul.f32 %v1320_v26, %v1301_v58  ;;  %v1357_v30 = vmul.f32 %v1356_v25, %v1341_v12  ;;  %v1346_v33 = vmul.f32 %v1345_v18, %v1341_v12 }
 0x4e9   : > { %v1310_v41 = vmul.f32 %v1309_v35, %v1301_v58 }
 0x4ea   : > { %v1322_v31 = vadd.f32 1.0, %v1321_v29  ;;  %v1358_v32 = vadd.f32 0.112945676, %v1357_v30  ;;  %v1347_v37 = vadd.f32 0.05243302, %v1346_v33  ;;  %v2583_v30 = vld [vmem:[%s3555_s9 + $0x28] sm:$0xff] }
 0x4eb   : > { %v1311_v44 = vadd.f32 1.1283791, %v1310_v41  ;;  %1474 = vmatpush.bf16.msrb.mxu0 %v2583_v30  ;;  %v2579_v33 = vld [vmem:[%s3555_s9 + $0x8] sm:$0xff] }
 0x4ec   : > { %2755 = vrcp.f32 %v1322_v31  ;;  %v1359_v34 = vmul.f32 %v1358_v32, %v1341_v12  ;;  %v1348_v28 = vmul.f32 %v1347_v37, %v1341_v12  ;;  %v1334_v14 = vand.u32 2147483648, %v1322_v31  ;;  %v2580_v32 = vld [vmem:[%s3555_s9 + $0x10] sm:$0xff] }
 0x4ed   : > { %v1332_v46 = vand.u32 2147483647, %v1322_v31  ;;  %vm1328_vm13 = vweird.f32 %v1322_v31  ;;  %v1312_v51 = vmul.f32 %v1311_v44, %v1298_v56 }
 0x4ee   : > { %v1360_v36 = vadd.f32 0.4994258, %v1359_v34  ;;  %v1349_v47 = vadd.f32 0.18741608, %v1348_v28  ;;  %v1335_v49 = vor.u32 1.1754944e-38, %v1334_v14  ;;  %v2578_v34 = vld [vmem:[%s3555_s9] sm:$0xff] }
 0x4ef   : > { %vm1333_vm15 = vcmp.eq.f32.partialorder %v1332_v46, 8.507059e+37 }
 0x4f0   : > { %v1361_v39 = vmul.f32 %v1360_v36, %v1341_v12  ;;  %v1350_v54 = vmul.f32 %v1349_v47, %v1341_v12 }
 0x4f2   : > { %v2756_v40 = vpop.eup %2755  ;;  %v1362_v19 = vadd.f32 1.0, %v1361_v39  ;;  %v1351_v61 = vadd.f32 1.1283791, %v1350_v54 }
 0x4f3   : > { %v1324_v42 = vmul.f32 %v2756_v40, %v1322_v31  ;;  %vm1329_vm12 = vweird.f32 %v2756_v40  ;;  %v2582_v31 = vld [vmem:[%s3555_s9 + $0x20] sm:$0xff] }
 0x4f4   : > { %2757 = vrcp.f32 %v1362_v19  ;;  %vm1330_vm14 = vmor %vm1328_vm13, %vm1329_vm12  ;;  %v1374_v60 = vand.u32 2147483648, %v1362_v19  ;;  %v1372_v2 = vand.u32 2147483647, %v1362_v19  ;;  %vm1368_vm1 = vweird.f32 %v1362_v19  ;;  %1475 = vmatpush.bf16.msrb.mxu0 %v2582_v31 }
 0x4f5   : > { %v1325_v7 = vsub.f32 1.0, %v1324_v42  ;;  %v1352_v9 = vmul.f32 %v1351_v61, %v3214_v3 }
 0x4f6   : > { %v1375_v6 = vor.u32 1.1754944e-38, %v1374_v60  ;;  %vm1373_vm6 = vcmp.eq.f32.partialorder %v1372_v2, 8.507059e+37 }
 0x4f7   : > { %v1326_v45 = vmul.f32 %v2756_v40, %v1325_v7 }
 0x4f8   : > { %1476 = vmatpush.bf16.msrb.mxu0 %v2581_v13 }
 0x4f9   : > { %v1327_v48 = vadd.f32 %v2756_v40, %v1326_v45  ;;  %v2737_v45 = vld [vmem:[%s3508_s10] ss:$0 sm:$0xff] }
 0x4fa   : > { %v2758_v50 = vpop.eup %2757 }
 0x4fb   : > { %v1331_v52 = vsel %vm1330_vm14, %v2756_v40, %v1327_v48  ;;  %v1364_v57 = vmul.f32 %v2758_v50, %v1362_v19  ;;  %vm1369_vm0 = vweird.f32 %v2758_v50 }
 0x4fc   : > { %v1336_v53 = vsel %vm1333_vm15, %v1335_v49, %v1331_v52  ;;  %vm1370_vm5 = vmor %vm1368_vm1, %vm1369_vm0  ;;  %1477 = vmatpush.bf16.msrb.mxu0 %v2580_v32  ;;  %vm1591_vm15 = vcmp.lt.s32.totalorder %v3045_v38, 4  ;;  %vm1599_vm0 = vcmp.lt.s32.totalorder %v3049_v43, 12  ;;  %vm1594_vm1 = vcmp.ge.s32.totalorder %v3045_v38, 4  ;;  %v2592_v43 = vld [vmem:[%s3511_s13 + $0x10] sm:$0xff]  ;;  %v2596_v38 = vld [vmem:[%s3517_s19] sm:$0xff] }
 0x4fd   : > { %v1337_v58 = vmul.f32 %v1336_v53, %v1312_v51  ;;  %v1365_v59 = vsub.f32 1.0, %v1364_v57 }
 0x4ff   : > { %v1366_v63 = vmul.f32 %v2758_v50, %v1365_v59  ;;  %v2422_v4 = vclamps-f32 %v1337_v58, 1.0 }
 0x500   : > { %1478 = vmatpush.bf16.msrb.mxu0 %v2579_v33 }
 0x501   : > { %v1367_v5 = vadd.f32 %v2758_v50, %v1366_v63  ;;  %v1380_v11 = vadd.f32 1.0, %v2422_v4 }
 0x503   : > { %v1371_v56 = vsel %vm1370_vm5, %v2758_v50, %v1367_v5  ;;  %v1382_v20 = vmul.f32 %v1380_v11, %v1296_v15 }
 0x504   : > { %v1376_v17 = vsel %vm1373_vm6, %v1375_v6, %v1371_v56  ;;  %1479 = vmatpush.bf16.msrb.mxu0 %v2578_v34 }
 0x505   : > { %v1377_v12 = vmul.f32 %v1376_v17, %v1352_v9  ;;  %v1397_v23 = vrot.slane %v1382_v20, 6  ;;  %v1403_v24 = vrot.slane %v1382_v20, 2 }
 0x507   : > { %v2423_v16 = vclamps-f32 %v1377_v12, 1.0 }
 0x509   : > { %v1381_v21 = vadd.f32 1.0, %v2423_v16 }
 0x50b   : > { %v1383_v22 = vmul.f32 %v1381_v21, %v1297_v1 }
 0x50d   : > { %v1398_v8 = vrot.slane %v1383_v22, 6  ;;  %v1404_v26 = vrot.slane %v1383_v22, 2  ;;  %v2683_v27 = vpack.i.bf16 %v1383_v22, %v1382_v20 }
 0x50f   : > { %2684 = vrot.lane.b32.xlu2 %v2683_v27, %s3551_s1  ;;  %v1405_v3 = vsel %vm1212_vm8, %v1403_v24, %v1404_v26  ;;  %v1406_v25 = vsel %vm1212_vm8, %v1404_v26, %v1403_v24  ;;  %v1399_v55 = vsel %vm1203_vm10, %v1397_v23, %v1398_v8  ;;  %v1400_v62 = vsel %vm1203_vm10, %v1398_v8, %v1397_v23 }
 0x510   : > { %v1408_v29 = vsel %vm1216_vm9, %v1406_v25, 0.0  ;;  %v1401_v40 = vsel %vm1206_vm11, %v1400_v62, 0.0 }
 0x511   : > { %v2688_v18 = vpack.i.bf16 %v1408_v29, %v1405_v3 }
 0x513   : > { %2689 = vrot.lane.b32.xlu1 %v2688_v18, %s3528_s26 }
 0x569   : > { %v2685_v35 = vpop.permute.xlu2 %2684 }
 0x56a   : > { %v2687_v36 = vunpack.i.h.bf16 %v2685_v35  ;;  %v2686_v37 = vunpack.i.l.bf16 %v2685_v35 }
 0x56c   : > { %v1425_v19 = vsel %vm844_vm2, %v1401_v40, %v2686_v37  ;;  %v1426_v28 = vsel %vm844_vm2, %v1399_v55, %v2687_v36 }
 0x585   : > { %v2690_v39 = vpop.permute.xlu1 %2689 }
 0x586   : > { %v2692_v41 = vunpack.i.h.bf16 %v2690_v39  ;;  %v2691_v42 = vunpack.i.l.bf16 %v2690_v39 }
 0x588   : > { %v1427_v7 = vsel %vm847_vm3, %v1425_v19, %v2691_v42  ;;  %v1428_v14 = vsel %vm847_vm3, %v1426_v28, %v2692_v41 }
 0x589   : > { %v1429_v44 = vpack.c.bf16 %v1428_v14, %v1427_v7 }
 0x58b   : > { %2448 = vmatmul.msk.bf16.vlgmr.msrb.gmra.mxu0 %vm890_vm4, %v1429_v44 }
 0x608   : > { %v1481_v46 = vpop.f32.mrf.mxu0 }
 0x609   : > { %v1482_v47 = vadd.f32 %v2737_v45, %v1481_v46 }
 0x60b   : > { %v3262_v48 = vadd.f32 %v1482_v47, %v3145_v0 }
 0x60d   : > { %v3265_v49 = vmul.f32 0.70710677, %v3262_v48 }
 0x60f   : > { %v1492_v50 = vmul.f32 %v3265_v49, %v3265_v49 }
 0x610   : > { %v1483_v51 = vpop.f32.mrf.mxu0 }
 0x611   : > { %v1493_v52 = vmin.f32 %v1492_v50, 16.0  ;;  %v1484_v53 = vadd.f32 %v2737_v45, %v1483_v51 }
 0x613   : > { %v1494_v54 = vmul.f32 2.1237322e-06, %v1493_v52  ;;  %v3270_v57 = vadd.f32 %v1484_v53, %v3153_v10  ;;  %v1505_v58 = vmul.f32 3.8918573e-05, %v1493_v52 }
 0x615   : > { %v1495_v59 = vadd.f32 0.00028619796, %v1494_v54  ;;  %v3273_v60 = vmul.f32 0.70710677, %v3270_v57  ;;  %v1506_v0 = vadd.f32 0.001143296, %v1505_v58 }
 0x617   : > { %v1496_v61 = vmul.f32 %v1495_v59, %v1493_v52  ;;  %v1532_v63 = vmul.f32 %v3273_v60, %v3273_v60  ;;  %v1507_v2 = vmul.f32 %v1506_v0, %v1493_v52 }
 0x619   : > { %v1533_v4 = vmin.f32 %v1532_v63, 16.0  ;;  %v1508_v5 = vadd.f32 0.014752088, %v1507_v2  ;;  %v1497_v6 = vadd.f32 0.0036580483, %v1496_v61 }
 0x61b   : > { %v1534_v9 = vmul.f32 2.1237322e-06, %v1533_v4  ;;  %v1545_v56 = vmul.f32 3.8918573e-05, %v1533_v4  ;;  %v1509_v11 = vmul.f32 %v1508_v5, %v1493_v52  ;;  %v1498_v15 = vmul.f32 %v1497_v6, %v1493_v52 }
 0x61c   : > { %v1488_v6 = vmul.f32 0.5, %v3262_v48 }
 0x61d   : > { %v1535_v17 = vadd.f32 0.00028619796, %v1534_v9  ;;  %v1546_v10 = vadd.f32 0.001143296, %v1545_v56  ;;  %v1510_v12 = vadd.f32 0.112945676, %v1509_v11 }
 0x61e   : > { %v1499_v24 = vadd.f32 0.05243302, %v1498_v15  ;;  %v1489_v56 = vmul.f32 0.5, %v3270_v57 }
 0x61f   : > { %v1536_v16 = vmul.f32 %v1535_v17, %v1533_v4  ;;  %v1547_v20 = vmul.f32 %v1546_v10, %v1533_v4  ;;  %v1511_v1 = vmul.f32 %v1510_v12, %v1493_v52 }
 0x620   : > { %v1500_v55 = vmul.f32 %v1499_v24, %v1493_v52  ;;  %v2587_v24 = vld [vmem:[%s3509_s11 + $0x18] sm:$0xff] }
 0x621   : > { %v1548_v21 = vadd.f32 0.014752088, %v1547_v20  ;;  %v1537_v22 = vadd.f32 0.0036580483, %v1536_v16  ;;  %v1512_v23 = vadd.f32 0.4994258, %v1511_v1 }
 0x622   : > { %v1501_v30 = vadd.f32 0.18741608, %v1500_v55 }
 0x623   : > { %v1549_v8 = vmul.f32 %v1548_v21, %v1533_v4  ;;  %v1513_v26 = vmul.f32 %v1512_v23, %v1493_v52  ;;  %v1538_v3 = vmul.f32 %v1537_v22, %v1533_v4  ;;  %v2589_v22 = vld [vmem:[%s3509_s11 + $0x28] sm:$0xff]  ;;  %v2588_v23 = vld [vmem:[%s3509_s11 + $0x20] sm:$0xff] }
 0x624   : > { %v1502_v34 = vmul.f32 %v1501_v30, %v1493_v52  ;;  %1667 = vmatpush.bf16.msrb.mxu1 %v2589_v22 }
 0x625   : > { %v1550_v27 = vadd.f32 0.112945676, %v1549_v8  ;;  %v1514_v25 = vadd.f32 1.0, %v1513_v26  ;;  %v1539_v18 = vadd.f32 0.05243302, %v1538_v3  ;;  %v2586_v8 = vld [vmem:[%s3509_s11 + $0x10] sm:$0xff] }
 0x626   : > { %v1503_v40 = vadd.f32 1.1283791, %v1502_v34  ;;  %v2585_v26 = vld [vmem:[%s3509_s11 + $0x8] sm:$0xff] }
 0x627   : > { %v1551_v62 = vmul.f32 %v1550_v27, %v1533_v4  ;;  %2759 = vrcp.f32 %v1514_v25  ;;  %v1540_v33 = vmul.f32 %v1539_v18, %v1533_v4  ;;  %v1526_v39 = vand.u32 2147483648, %v1514_v25  ;;  %v2584_v27 = vld [vmem:[%s3509_s11] sm:$0xff] }
 0x628   : > { %v1524_v42 = vand.u32 2147483647, %v1514_v25  ;;  %vm1520_vm8 = vweird.f32 %v1514_v25  ;;  %v1504_v45 = vmul.f32 %v1503_v40, %v3265_v49  ;;  %1668 = vmatpush.bf16.msrb.mxu1 %v2588_v23 }
 0x629   : > { %v1552_v29 = vadd.f32 0.4994258, %v1551_v62  ;;  %v1541_v37 = vadd.f32 0.18741608, %v1540_v33  ;;  %v1527_v14 = vor.u32 1.1754944e-38, %v1526_v39 }
 0x62a   : > { %vm1525_vm10 = vcmp.eq.f32.partialorder %v1524_v42, 8.507059e+37 }
 0x62b   : > { %v1553_v31 = vmul.f32 %v1552_v29, %v1533_v4  ;;  %v1542_v7 = vmul.f32 %v1541_v37, %v1533_v4 }
 0x62c   : > { %1669 = vmatpush.bf16.msrb.mxu1 %v2587_v24 }
 0x62d   : > { %v1554_v13 = vadd.f32 1.0, %v1553_v31  ;;  %v2760_v32 = vpop.eup %2759  ;;  %v1543_v53 = vadd.f32 1.1283791, %v1542_v7 }
 0x62e   : > { %v1516_v35 = vmul.f32 %v2760_v32, %v1514_v25  ;;  %vm1521_vm7 = vweird.f32 %v2760_v32 }
 0x62f   : > { %2761 = vrcp.f32 %v1554_v13  ;;  %vm1522_vm9 = vmor %vm1520_vm8, %vm1521_vm7  ;;  %v1566_v52 = vand.u32 2147483648, %v1554_v13  ;;  %v1564_v58 = vand.u32 2147483647, %v1554_v13  ;;  %vm1560_vm12 = vweird.f32 %v1554_v13 }
 0x630   : > { %v1517_v36 = vsub.f32 1.0, %v1516_v35  ;;  %v1544_v63 = vmul.f32 %v1543_v53, %v3273_v60  ;;  %1670 = vmatpush.bf16.msrb.mxu1 %v2586_v8  ;;  %v2738_v35 = vld [vmem:[%s3510_s12] ss:$0 sm:$0xff] }
 0x631   : > { %v1567_v61 = vor.u32 1.1754944e-38, %v1566_v52  ;;  %vm1565_vm14 = vcmp.eq.f32.partialorder %v1564_v58, 8.507059e+37 }
 0x632   : > { %v1518_v41 = vmul.f32 %v2760_v32, %v1517_v36 }
 0x634   : > { %v1519_v28 = vadd.f32 %v2760_v32, %v1518_v41  ;;  %1671 = vmatpush.bf16.msrb.mxu1 %v2585_v26 }
 0x635   : > { %v2762_v19 = vpop.eup %2761 }
 0x636   : > { %v1556_v44 = vmul.f32 %v2762_v19, %v1554_v13  ;;  %v1523_v46 = vsel %vm1522_vm9, %v2760_v32, %v1519_v28  ;;  %vm1561_vm11 = vweird.f32 %v2762_v19 }
 0x637   : > { %v1528_v47 = vsel %vm1525_vm10, %v1527_v14, %v1523_v46  ;;  %vm1562_vm13 = vmor %vm1560_vm12, %vm1561_vm11 }
 0x638   : > { %v1557_v50 = vsub.f32 1.0, %v1556_v44  ;;  %v1529_v51 = vmul.f32 %v1528_v47, %v1504_v45  ;;  %1672 = vmatpush.bf16.msrb.mxu1 %v2584_v27 }
 0x63a   : > { %v1558_v54 = vmul.f32 %v2762_v19, %v1557_v50  ;;  %v2449_v59 = vclamps-f32 %v1529_v51, 1.0 }
 0x63c   : > { %v1559_v0 = vadd.f32 %v2762_v19, %v1558_v54  ;;  %v1572_v5 = vadd.f32 1.0, %v2449_v59 }
 0x63e   : > { %v1563_v2 = vsel %vm1562_vm13, %v2762_v19, %v1559_v0  ;;  %v1574_v17 = vmul.f32 %v1572_v5, %v1488_v6 }
 0x63f   : > { %v1568_v49 = vsel %vm1565_vm14, %v1567_v61, %v1563_v2 }
 0x640   : > { %v1569_v4 = vmul.f32 %v1568_v49, %v1544_v63  ;;  %v1589_v16 = vrot.slane %v1574_v17, 4 }
 0x642   : > { %v2450_v9 = vclamps-f32 %v1569_v4, 1.0 }
 0x644   : > { %v1573_v11 = vadd.f32 1.0, %v2450_v9 }
 0x646   : > { %v1575_v10 = vmul.f32 %v1573_v11, %v1489_v56 }
 0x648   : > { %v1590_v12 = vrot.slane %v1575_v10, 4  ;;  %v2693_v15 = vpack.i.bf16 %v1575_v10, %v1574_v17 }
 0x64a   : > { %2694 = vrot.lane.b32.xlu2 %v2693_v15, %s3551_s1  ;;  %v1592_v60 = vsel %vm1591_vm15, %v1589_v16, %v1590_v12  ;;  %v1593_v20 = vsel %vm1591_vm15, %v1590_v12, %v1589_v16 }
 0x64b   : > { %v1601_v1 = vsel %vm1599_vm0, %v1593_v20, 0.0  ;;  %v1596_v29 = vsel %vm1594_vm1, %v1593_v20, 0.0 }
 0x64c   : > { %v2698_v21 = vpack.i.bf16 %v1601_v1, %v1592_v60 }
 0x64e   : > { %2699 = vrot.lane.b32.xlu1 %v2698_v21, %s3556_s8 }
 0x6a4   : > { %v2695_v3 = vpop.permute.xlu2 %2694 }
 0x6a5   : > { %v2697_v25 = vunpack.i.h.bf16 %v2695_v3  ;;  %v2696_v55 = vunpack.i.l.bf16 %v2695_v3 }
 0x6a7   : > { %v1618_v31 = vsel %vm844_vm2, %v1596_v29, %v2696_v55  ;;  %v1619_v13 = vsel %vm844_vm2, %v1592_v60, %v2697_v25 }
 0x6c0   : > { %v2700_v62 = vpop.permute.xlu1 %2699 }
 0x6c1   : > { %v2702_v18 = vunpack.i.h.bf16 %v2700_v62  ;;  %v2701_v30 = vunpack.i.l.bf16 %v2700_v62 }
 0x6c3   : > { %v1620_v32 = vsel %vm847_vm3, %v1618_v31, %v2701_v30  ;;  %v1621_v33 = vsel %vm847_vm3, %v1619_v13, %v2702_v18 }
 0x6c4   : > { %v1622_v34 = vpack.c.bf16 %v1621_v33, %v1620_v32 }
 0x6c6   : > { %2475 = vmatmul.msk.bf16.vlgmr.msrb.gmra.mxu1 %vm890_vm4, %v1622_v34 }
 0x743   : > { %v1674_v36 = vpop.f32.mrf.mxu1 }
 0x744   : > { %v3320_v37 = vadd.f32 %v2738_v35, %v1674_v36 }
 0x746   : > { %v1681_v39 = vmul.f32 0.70710677, %v3320_v37 }
 0x748   : > { %v1683_v40 = vmul.f32 %v1681_v39, %v1681_v39 }
 0x74a   : > { %v1684_v41 = vmin.f32 %v1683_v40, 16.0 }
 0x74b   : > { %v1676_v42 = vpop.f32.mrf.mxu1 }
 0x74c   : > { %v1685_v19 = vmul.f32 2.1237322e-06, %v1684_v41  ;;  %v1696_v28 = vmul.f32 3.8918573e-05, %v1684_v41  ;;  %v3323_v7 = vadd.f32 %v2738_v35, %v1676_v42 }
 0x74e   : > { %v1686_v14 = vadd.f32 0.00028619796, %v1685_v19  ;;  %v1697_v44 = vadd.f32 0.001143296, %v1696_v28  ;;  %v3326_v45 = vmul.f32 0.70710677, %v3323_v7 }
 0x750   : > { %v1687_v46 = vmul.f32 %v1686_v14, %v1684_v41  ;;  %v1698_v47 = vmul.f32 %v1697_v44, %v1684_v41  ;;  %v1723_v50 = vmul.f32 %v3326_v45, %v3326_v45 }
 0x752   : > { %v1699_v51 = vadd.f32 0.014752088, %v1698_v47  ;;  %v1724_v52 = vmin.f32 %v1723_v50, 16.0  ;;  %v1688_v53 = vadd.f32 0.0036580483, %v1687_v46 }
 0x754   : > { %v1700_v54 = vmul.f32 %v1699_v51, %v1684_v41  ;;  %v1725_v58 = vmul.f32 2.1237322e-06, %v1724_v52  ;;  %v1736_v59 = vmul.f32 3.8918573e-05, %v1724_v52  ;;  %v1689_v2 = vmul.f32 %v1688_v53, %v1684_v41 }
 0x756   : > { %v1701_v0 = vadd.f32 0.112945676, %v1700_v54  ;;  %v1726_v61 = vadd.f32 0.00028619796, %v1725_v58  ;;  %v1737_v63 = vadd.f32 0.001143296, %v1736_v59 }
 0x757   : > { %v1690_v56 = vadd.f32 0.05243302, %v1689_v2  ;;  %v1679_v58 = vmul.f32 0.5, %v3320_v37 }
 0x758   : > { %v1702_v49 = vmul.f32 %v1701_v0, %v1684_v41  ;;  %v1727_v4 = vmul.f32 %v1726_v61, %v1724_v52  ;;  %v1738_v5 = vmul.f32 %v1737_v63, %v1724_v52  ;;  %v1680_v61 = vmul.f32 0.5, %v3323_v7  ;;  %v2595_v7 = vld [vmem:[%s3511_s13 + $0x28] sm:$0xff] }
 0x759   : > { %v1691_v16 = vmul.f32 %v1690_v56, %v1684_v41  ;;  %1853 = vmatpush.bf16.msrb.mxu2 %v2595_v7  ;;  %v2594_v56 = vld [vmem:[%s3511_s13 + $0x20] sm:$0xff] }
 0x75a   : > { %v1703_v6 = vadd.f32 0.4994258, %v1702_v49  ;;  %v1739_v9 = vadd.f32 0.014752088, %v1738_v5  ;;  %v1728_v17 = vadd.f32 0.0036580483, %v1727_v4 }
 0x75b   : > { %v1692_v21 = vadd.f32 0.18741608, %v1691_v16 }
 0x75c   : > { %v1704_v11 = vmul.f32 %v1703_v6, %v1684_v41  ;;  %v1740_v10 = vmul.f32 %v1739_v9, %v1724_v52  ;;  %v1729_v60 = vmul.f32 %v1728_v17, %v1724_v52  ;;  %v2591_v17 = vld [vmem:[%s3511_s13 + $0x8] sm:$0xff] }
 0x75d   : > { %v1693_v27 = vmul.f32 %v1692_v21, %v1684_v41  ;;  %1854 = vmatpush.bf16.msrb.mxu2 %v2594_v56 }
 0x75e   : > { %v1705_v12 = vadd.f32 1.0, %v1704_v11  ;;  %v1741_v15 = vadd.f32 0.112945676, %v1740_v10  ;;  %v1730_v22 = vadd.f32 0.05243302, %v1729_v60  ;;  %v2593_v11 = vld [vmem:[%s3511_s13 + $0x18] sm:$0xff] }
 0x75f   : > { %v1694_v18 = vadd.f32 1.1283791, %v1693_v27  ;;  %v2590_v10 = vld [vmem:[%s3511_s13] sm:$0xff]  ;;  %v2597_v27 = vld [vmem:[%s3517_s19 + $0x8] sm:$0xff] }
 0x760   : > { %2763 = vrcp.f32 %v1705_v12  ;;  %v1742_v20 = vmul.f32 %v1741_v15, %v1724_v52  ;;  %v1731_v3 = vmul.f32 %v1730_v22, %v1724_v52  ;;  %v1717_v55 = vand.u32 2147483648, %v1705_v12  ;;  %1897 = vmatpush.bf16.msrb.mxu3 %v2597_v27 }
 0x761   : > { %v1715_v29 = vand.u32 2147483647, %v1705_v12  ;;  %vm1711_vm6 = vweird.f32 %v1705_v12  ;;  %v1695_v34 = vmul.f32 %v1694_v18, %v1681_v39  ;;  %1855 = vmatpush.bf16.msrb.mxu2 %v2593_v11 }
 0x762   : > { %v1743_v1 = vadd.f32 0.4994258, %v1742_v20  ;;  %v1732_v30 = vadd.f32 0.18741608, %v1731_v3  ;;  %v1718_v13 = vor.u32 1.1754944e-38, %v1717_v55 }
 0x763   : > { %vm1716_vm8 = vcmp.eq.f32.partialorder %v1715_v29, 8.507059e+37  ;;  %v2739_v3 = vld [vmem:[%s3512_s14] ss:$0 sm:$0xff] }
 0x764   : > { %v1744_v23 = vmul.f32 %v1743_v1, %v1724_v52  ;;  %v1733_v36 = vmul.f32 %v1732_v30, %v1724_v52  ;;  %1898 = vmatpush.bf16.msrb.mxu3 %v2596_v38 }
 0x765   : > { %1856 = vmatpush.bf16.msrb.mxu2 %v2592_v43 }
 0x766   : > { %v2764_v24 = vpop.eup %2763  ;;  %v1745_v26 = vadd.f32 1.0, %v1744_v23  ;;  %v1734_v28 = vadd.f32 1.1283791, %v1733_v36 }
 0x767   : > { %v1707_v8 = vmul.f32 %v2764_v24, %v1705_v12  ;;  %vm1712_vm5 = vweird.f32 %v2764_v24 }
 0x768   : > { %2765 = vrcp.f32 %v1745_v26  ;;  %vm1713_vm7 = vmor %vm1711_vm6, %vm1712_vm5  ;;  %v1757_v19 = vand.u32 2147483648, %v1745_v26  ;;  %v1755_v44 = vand.u32 2147483647, %v1745_v26  ;;  %vm1751_vm10 = vweird.f32 %v1745_v26 }
 0x769   : > { %v1708_v25 = vsub.f32 1.0, %v1707_v8  ;;  %v1735_v51 = vmul.f32 %v1734_v28, %v3326_v45  ;;  %1857 = vmatpush.bf16.msrb.mxu2 %v2591_v17 }
 0x76a   : > { %v1758_v50 = vor.u32 1.1754944e-38, %v1757_v19  ;;  %vm1756_vm12 = vcmp.eq.f32.partialorder %v1755_v44, 8.507059e+37 }
 0x76b   : > { %v1709_v62 = vmul.f32 %v2764_v24, %v1708_v25 }
 0x76d   : > { %v1710_v31 = vadd.f32 %v2764_v24, %v1709_v62  ;;  %1858 = vmatpush.bf16.msrb.mxu2 %v2590_v10 }
 0x76e   : > { %v2766_v32 = vpop.eup %2765 }
 0x76f   : > { %v1714_v33 = vsel %vm1713_vm7, %v2764_v24, %v1710_v31  ;;  %v1747_v40 = vmul.f32 %v2766_v32, %v1745_v26  ;;  %vm1752_vm9 = vweird.f32 %v2766_v32 }
 0x770   : > { %v1719_v35 = vsel %vm1716_vm8, %v1718_v13, %v1714_v33  ;;  %vm1753_vm11 = vmor %vm1751_vm10, %vm1752_vm9 }
 0x771   : > { %v1720_v41 = vmul.f32 %v1719_v35, %v1695_v34  ;;  %v1748_v42 = vsub.f32 1.0, %v1747_v40 }
 0x773   : > { %v1749_v14 = vmul.f32 %v2766_v32, %v1748_v42  ;;  %v2476_v46 = vclamps-f32 %v1720_v41, 1.0 }
 0x775   : > { %v1750_v47 = vadd.f32 %v2766_v32, %v1749_v14  ;;  %v1763_v54 = vadd.f32 1.0, %v2476_v46 }
 0x777   : > { %v1754_v53 = vsel %vm1753_vm11, %v2766_v32, %v1750_v47  ;;  %v1765_v0 = vmul.f32 %v1763_v54, %v1679_v58 }
 0x778   : > { %v1759_v39 = vsel %vm1756_vm12, %v1758_v50, %v1754_v53 }
 0x779   : > { %v1760_v52 = vmul.f32 %v1759_v39, %v1735_v51  ;;  %v1780_v49 = vrot.slane %v1765_v0, 4 }
 0x77b   : > { %v2477_v59 = vclamps-f32 %v1760_v52, 1.0 }
 0x77d   : > { %v1764_v63 = vadd.f32 1.0, %v2477_v59 }
 0x77f   : > { %v1766_v2 = vmul.f32 %v1764_v63, %v1680_v61 }
 0x781   : > { %v1781_v4 = vrot.slane %v1766_v2, 4  ;;  %v2703_v5 = vpack.i.bf16 %v1766_v2, %v1765_v0 }
 0x783   : > { %2704 = vrot.lane.b32.xlu2 %v2703_v5, %s3551_s1  ;;  %v1782_v45 = vsel %vm1591_vm15, %v1780_v49, %v1781_v4  ;;  %v1783_v6 = vsel %vm1591_vm15, %v1781_v4, %v1780_v49 }
 0x784   : > { %v1787_v37 = vsel %vm1599_vm0, %v1783_v6, 0.0  ;;  %v1784_v20 = vsel %vm1594_vm1, %v1783_v6, 0.0 }
 0x785   : > { %v2708_v9 = vpack.i.bf16 %v1787_v37, %v1782_v45 }
 0x787   : > { %2709 = vrot.lane.b32.xlu0 %v2708_v9, %s3556_s8 }
 0x7dd   : > { %v2705_v12 = vpop.permute.xlu2 %2704 }
 0x7de   : > { %v2707_v15 = vunpack.i.h.bf16 %v2705_v12  ;;  %v2706_v16 = vunpack.i.l.bf16 %v2705_v12 }
 0x7e0   : > { %v1804_v22 = vsel %vm844_vm2, %v1784_v20, %v2706_v16  ;;  %v1805_v23 = vsel %vm844_vm2, %v1782_v45, %v2707_v15 }
 0x7f9   : > { %v2710_v60 = vpop.permute.xlu0 %2709 }
 0x7fa   : > { %v2712_v1 = vunpack.i.h.bf16 %v2710_v60  ;;  %v2711_v21 = vunpack.i.l.bf16 %v2710_v60 }
 0x7fc   : > { %v1806_v24 = vsel %vm847_vm3, %v1804_v22, %v2711_v21  ;;  %v1807_v8 = vsel %vm847_vm3, %v1805_v23, %v2712_v1 }
 0x7fd   : > { %v1808_v26 = vpack.c.bf16 %v1807_v8, %v1806_v24 }
 0x7ff   : > { %2502 = vmatmul.msk.bf16.vlgmr.msrb.gmra.mxu2 %vm890_vm4, %v1808_v26 }
 0x882   : > { %v1860_v25 = vpop.f32.mrf.mxu2 }
 0x883   : > { %v1861_v55 = vadd.f32 %v2739_v3, %v1860_v25 }
 0x885   : > { %v3376_v62 = vadd.f32 %v1861_v55, %v3262_v48 }
 0x887   : > { %v3379_v29 = vmul.f32 0.70710677, %v3376_v62 }
 0x889   : > { %v1909_v18 = vmul.f32 %v3379_v29, %v3379_v29 }
 0x88a   : > { %v1862_v30 = vpop.f32.mrf.mxu2 }
 0x88b   : > { %v1910_v31 = vmin.f32 %v1909_v18, 16.0  ;;  %v1863_v13 = vadd.f32 %v2739_v3, %v1862_v30 }
 0x88d   : > { %v1911_v32 = vmul.f32 2.1237322e-06, %v1910_v31  ;;  %v3384_v33 = vadd.f32 %v1863_v13, %v3270_v57  ;;  %v1922_v34 = vmul.f32 3.8918573e-05, %v1910_v31 }
 0x88f   : > { %v1912_v35 = vadd.f32 0.00028619796, %v1911_v32  ;;  %v1867_v36 = vpack.c.bf16 %v3384_v33, %v3376_v62  ;;  %v3389_v48 = vmul.f32 0.70710677, %v3384_v33  ;;  %v1923_v40 = vadd.f32 0.001143296, %v1922_v34 }
 0x891   : > { %v1949_v41 = vmul.f32 %v3389_v48, %v3389_v48  ;;  %2511 = vmatmul.msk.bf16.vlgmr.msrb.gmra.mxu3 %vm844_vm2, %v1867_v36  ;;  %v1913_v42 = vmul.f32 %v1912_v35, %v1910_v31  ;;  %v1924_v19 = vmul.f32 %v1923_v40, %v1910_v31 }
 0x893   : > { %v1950_v28 = vmin.f32 %v1949_v41, 16.0  ;;  %v1925_v14 = vadd.f32 0.014752088, %v1924_v19  ;;  %v1914_v46 = vadd.f32 0.0036580483, %v1913_v42 }
 0x895   : > { %v1951_v57 = vmul.f32 2.1237322e-06, %v1950_v28  ;;  %v1962_v44 = vmul.f32 3.8918573e-05, %v1950_v28  ;;  %v1926_v47 = vmul.f32 %v1925_v14, %v1910_v31  ;;  %v1915_v52 = vmul.f32 %v1914_v46, %v1910_v31 }
 0x896   : > { %v1905_v14 = vmul.f32 0.5, %v3376_v62  ;;  %v2602_v62 = vld [vmem:[%s3513_s15 + $0x20] sm:$0xff] }
 0x897   : > { %v1952_v50 = vadd.f32 0.00028619796, %v1951_v57  ;;  %v1963_v51 = vadd.f32 0.001143296, %v1962_v44  ;;  %v1927_v53 = vadd.f32 0.112945676, %v1926_v47 }
 0x898   : > { %v1916_v2 = vadd.f32 0.05243302, %v1915_v52  ;;  %v1906_v57 = vmul.f32 0.5, %v3384_v33  ;;  %v2601_v33 = vld [vmem:[%s3513_s15 + $0x18] sm:$0xff] }
 0x899   : > { %v1953_v39 = vmul.f32 %v1952_v50, %v1950_v28  ;;  %v1964_v54 = vmul.f32 %v1963_v51, %v1950_v28  ;;  %v1928_v58 = vmul.f32 %v1927_v53, %v1910_v31  ;;  %v2600_v53 = vld [vmem:[%s3513_s15 + $0x10] sm:$0xff] }
 0x89a   : > { %v1917_v37 = vmul.f32 %v1916_v2, %v1910_v31 }
 0x89b   : > { %v1954_v59 = vadd.f32 0.0036580483, %v1953_v39  ;;  %v1965_v0 = vadd.f32 0.014752088, %v1964_v54  ;;  %v1929_v61 = vadd.f32 0.4994258, %v1928_v58 }
 0x89c   : > { %v1918_v11 = vadd.f32 0.18741608, %v1917_v37  ;;  %v2599_v39 = vld [vmem:[%s3513_s15 + $0x8] sm:$0xff]  ;;  %v2598_v54 = vld [vmem:[%s3513_s15] sm:$0xff] }
 0x89d   : > { %v1966_v63 = vmul.f32 %v1965_v0, %v1950_v28  ;;  %v1930_v49 = vmul.f32 %v1929_v61, %v1910_v31  ;;  %v1955_v4 = vmul.f32 %v1954_v59, %v1950_v28 }
 0x89e   : > { %v1919_v12 = vmul.f32 %v1918_v11, %v1910_v31 }
 0x89f   : > { %v1967_v5 = vadd.f32 0.112945676, %v1966_v63  ;;  %v1931_v45 = vadd.f32 1.0, %v1930_v49  ;;  %v1956_v9 = vadd.f32 0.05243302, %v1955_v4 }
 0x8a0   : > { %v1920_v1 = vadd.f32 1.1283791, %v1919_v12 }
 0x8a1   : > { %v1968_v6 = vmul.f32 %v1967_v5, %v1950_v28  ;;  %2767 = vrcp.f32 %v1931_v45  ;;  %v1957_v43 = vmul.f32 %v1956_v9, %v1950_v28  ;;  %v1943_v20 = vand.u32 2147483648, %v1931_v45 }
 0x8a2   : > { %v1941_v22 = vand.u32 2147483647, %v1931_v45  ;;  %vm1937_vm14 = vweird.f32 %v1931_v45  ;;  %v1921_v38 = vmul.f32 %v1920_v1, %v3379_v29 }
 0x8a3   : > { %v1969_v7 = vadd.f32 0.4994258, %v1968_v6  ;;  %v1958_v16 = vadd.f32 0.18741608, %v1957_v43  ;;  %v1944_v27 = vor.u32 1.1754944e-38, %v1943_v20 }
 0x8a4   : > { %vm1942_vm0 = vcmp.eq.f32.partialorder %v1941_v22, 8.507059e+37  ;;  %v2741_v6 = vld [vmem:[%s3514_s16] ss:$0 sm:$0xff] }
 0x8a5   : > { %v1970_v56 = vmul.f32 %v1969_v7, %v1950_v28  ;;  %v1959_v24 = vmul.f32 %v1958_v16, %v1950_v28 }
 0x8a7   : > { %v1971_v17 = vadd.f32 1.0, %v1970_v56  ;;  %v2768_v10 = vpop.eup %2767  ;;  %v1960_v55 = vadd.f32 1.1283791, %v1959_v24 }
 0x8a8   : > { %v1933_v15 = vmul.f32 %v2768_v10, %v1931_v45  ;;  %vm1938_vm13 = vweird.f32 %v2768_v10 }
 0x8a9   : > { %2769 = vrcp.f32 %v1971_v17  ;;  %vm1939_vm15 = vmor %vm1937_vm14, %vm1938_vm13  ;;  %v1983_v18 = vand.u32 2147483648, %v1971_v17  ;;  %v1981_v13 = vand.u32 2147483647, %v1971_v17  ;;  %vm1977_vm5 = vweird.f32 %v1971_v17 }
 0x8aa   : > { %v1934_v60 = vsub.f32 1.0, %v1933_v15  ;;  %v1961_v36 = vmul.f32 %v1960_v55, %v3389_v48  ;;  %v2603_v48 = vld [vmem:[%s3513_s15 + $0x28] sm:$0xff]  ;;  %vm2206_vm14 = vcmask 130048  }
 0x8ab   : > { %v1984_v35 = vor.u32 1.1754944e-38, %v1983_v18  ;;  %vm1982_vm7 = vcmp.eq.f32.partialorder %v1981_v13, 8.507059e+37  ;;  %2079 = vmatpush.bf16.msra.mxu0 %v2603_v48 }
 0x8ac   : > { %v1935_v21 = vmul.f32 %v2768_v10, %v1934_v60 }
 0x8ae   : > { %v1936_v26 = vadd.f32 %v2768_v10, %v1935_v21 }
 0x8af   : > { %v2770_v23 = vpop.eup %2769  ;;  %2080 = vmatpush.bf16.msra.mxu0 %v2602_v62 }
 0x8b0   : > { %v1973_v8 = vmul.f32 %v2770_v23, %v1971_v17  ;;  %v1940_v25 = vsel %vm1939_vm15, %v2768_v10, %v1936_v26  ;;  %vm1978_vm1 = vweird.f32 %v2770_v23  ;;  %vm2233_vm15 = vcmask 392192  }
 0x8b1   : > { %v1945_v30 = vsel %vm1942_vm0, %v1944_v27, %v1940_v25  ;;  %vm1979_vm6 = vmor %vm1977_vm5, %vm1978_vm1 }
 0x8b2   : > { %v1974_v3 = vsub.f32 1.0, %v1973_v8  ;;  %v1946_v32 = vmul.f32 %v1945_v30, %v1921_v38 }
 0x8b3   : > { %2081 = vmatpush.bf16.msra.mxu0 %v2601_v33 }
 0x8b4   : > { %v1975_v31 = vmul.f32 %v2770_v23, %v1974_v3  ;;  %v2512_v41 = vclamps-f32 %v1946_v32, 1.0 }
 0x8b6   : > { %v1976_v34 = vadd.f32 %v2770_v23, %v1975_v31  ;;  %v1989_v28 = vadd.f32 1.0, %v2512_v41 }
 0x8b7   : > { %2082 = vmatpush.bf16.msra.mxu0 %v2600_v53 }
 0x8b8   : > { %v1980_v40 = vsel %vm1979_vm6, %v2770_v23, %v1976_v34  ;;  %v1991_v47 = vmul.f32 %v1989_v28, %v1905_v14 }
 0x8b9   : > { %v1985_v29 = vsel %vm1982_vm7, %v1984_v35, %v1980_v40 }
 0x8ba   : > { %v1986_v42 = vmul.f32 %v1985_v29, %v1961_v36 }
 0x8bb   : > { %2083 = vmatpush.bf16.msra.mxu0 %v2599_v39 }
 0x8bc   : > { %v2513_v19 = vclamps-f32 %v1986_v42, 1.0 }
 0x8be   : > { %v1990_v44 = vadd.f32 1.0, %v2513_v19 }
 0x8bf   : > { %2084 = vmatpush.bf16.msra.mxu0 %v2598_v54 }
 0x8c0   : > { %v1992_v46 = vmul.f32 %v1990_v44, %v1906_v57  ;;  %v2606_v44 = vld [vmem:[%s3515_s17 + $0x10] sm:$0xff] }
 0x8c1   : > { %2242 = vmatpush.bf16.msra.mxu3 %v2606_v44 }
 0x8c2   : > { %v2718_v50 = vpack.i.bf16 0.0, %v1992_v46  ;;  %v2713_v51 = vpack.i.bf16 %v1992_v46, %v1991_v47 }
 0x8c4   : > { %2719 = vrot.lane.b32.xlu2 %v2718_v50, %s3556_s8  ;;  %2714 = vrot.lane.b32.xlu1 %v2713_v51, %s3551_s1  ;;  %v2605_v51 = vld [vmem:[%s3515_s17 + $0x8] sm:$0xff] }
 0x8c5   : > { %2243 = vmatpush.bf16.msra.mxu3 %v2605_v51 }
 0x91e   : > { %v2720_v52 = vpop.permute.xlu2 %2719 }
 0x91f   : > { %v2722_v61 = vunpack.i.h.bf16 %v2720_v52  ;;  %v2721_v63 = vunpack.i.l.bf16 %v2720_v52 }
 0x936   : > { %v2715_v58 = vpop.permute.xlu1 %2714 }
 0x937   : > { %v2717_v59 = vunpack.i.h.bf16 %v2715_v58  ;;  %v2716_v0 = vunpack.i.l.bf16 %v2715_v58 }
 0x939   : > { %v2031_v2 = vsel %vm844_vm2, %v1991_v47, %v2717_v59  ;;  %v2030_v49 = vsel %vm844_vm2, 0.0, %v2716_v0 }
 0x93a   : > { %v2033_v4 = vsel %vm847_vm3, %v2031_v2, %v2722_v61  ;;  %v2032_v5 = vsel %vm847_vm3, %v2030_v49, %v2721_v63 }
 0x93b   : > { %v2034_v45 = vpack.c.bf16 %v2033_v4, %v2032_v5 }
 0x93d   : > { %2538 = vmatmul.msk.bf16.vlgmr.msra.gmra.mxu0 %vm890_vm4, %v2034_v45 }
 0x9ba   : > { %v2086_v37 = vpop.f32.mrf.mxu0 }
 0x9bb   : > { %v3426_v9 = vadd.f32 %v2741_v6, %v2086_v37 }
 0x9bd   : > { %v3429_v7 = vmul.f32 0.70710677, %v3426_v9 }
 0x9bf   : > { %v2095_v56 = vmul.f32 %v3429_v7, %v3429_v7 }
 0x9c1   : > { %v2096_v11 = vmin.f32 %v2095_v56, 16.0 }
 0x9c2   : > { %v2088_v43 = vpop.f32.mrf.mxu0 }
 0x9c3   : > { %v2097_v17 = vmul.f32 2.1237322e-06, %v2096_v11  ;;  %v2108_v10 = vmul.f32 3.8918573e-05, %v2096_v11  ;;  %v3433_v12 = vadd.f32 %v2741_v6, %v2088_v43 }
 0x9c5   : > { %v2098_v15 = vadd.f32 0.00028619796, %v2097_v17  ;;  %v2109_v16 = vadd.f32 0.001143296, %v2108_v10  ;;  %v3436_v60 = vmul.f32 0.70710677, %v3433_v12 }
 0x9c7   : > { %v2110_v20 = vmul.f32 %v2109_v16, %v2096_v11  ;;  %v2135_v1 = vmul.f32 %v3436_v60, %v3436_v60  ;;  %v2099_v21 = vmul.f32 %v2098_v15, %v2096_v11 }
 0x9c9   : > { %v2111_v22 = vadd.f32 0.014752088, %v2110_v20  ;;  %v2136_v23 = vmin.f32 %v2135_v1, 16.0  ;;  %v2100_v27 = vadd.f32 0.0036580483, %v2099_v21 }
 0x9cb   : > { %v2112_v24 = vmul.f32 %v2111_v22, %v2096_v11  ;;  %v2137_v8 = vmul.f32 2.1237322e-06, %v2136_v23  ;;  %v2148_v26 = vmul.f32 3.8918573e-05, %v2136_v23  ;;  %v2101_v31 = vmul.f32 %v2100_v27, %v2096_v11 }
 0x9cd   : > { %v2113_v38 = vadd.f32 0.112945676, %v2112_v24  ;;  %v2138_v3 = vadd.f32 0.00028619796, %v2137_v8  ;;  %v2149_v25 = vadd.f32 0.001143296, %v2148_v26 }
 0x9ce   : > { %v2102_v40 = vadd.f32 0.05243302, %v2101_v31  ;;  %v2091_v8 = vmul.f32 0.5, %v3426_v9  ;;  %v2092_v26 = vmul.f32 0.5, %v3433_v12 }
 0x9cf   : > { %v2114_v55 = vmul.f32 %v2113_v38, %v2096_v11  ;;  %v2139_v18 = vmul.f32 %v2138_v3, %v2136_v23  ;;  %v2150_v30 = vmul.f32 %v2149_v25, %v2136_v23 }
 0x9d0   : > { %v2103_v28 = vmul.f32 %v2102_v40, %v2096_v11 }
 0x9d1   : > { %v2115_v13 = vadd.f32 0.4994258, %v2114_v55  ;;  %v2140_v32 = vadd.f32 0.0036580483, %v2139_v18  ;;  %v2151_v34 = vadd.f32 0.014752088, %v2150_v30 }
 0x9d2   : > { %v2104_v50 = vadd.f32 0.18741608, %v2103_v28 }
 0x9d3   : > { %v2116_v35 = vmul.f32 %v2115_v13, %v2096_v11  ;;  %v2152_v36 = vmul.f32 %v2151_v34, %v2136_v23  ;;  %v2141_v29 = vmul.f32 %v2140_v32, %v2136_v23 }
 0x9d4   : > { %v2105_v39 = vmul.f32 %v2104_v50, %v2096_v11 }
 0x9d5   : > { %v2117_v41 = vadd.f32 1.0, %v2116_v35  ;;  %v2153_v42 = vadd.f32 0.112945676, %v2152_v36  ;;  %v2142_v14 = vadd.f32 0.05243302, %v2141_v29 }
 0x9d6   : > { %v2106_v61 = vadd.f32 1.1283791, %v2105_v39 }
 0x9d7   : > { %2771 = vrcp.f32 %v2117_v41  ;;  %v2154_v19 = vmul.f32 %v2153_v42, %v2136_v23  ;;  %v2143_v62 = vmul.f32 %v2142_v14, %v2136_v23  ;;  %v2129_v52 = vand.u32 2147483648, %v2117_v41  ;;  %v2740_v42 = vld [vmem:[%s3518_s20] ss:$0 sm:$0xff] }
 0x9d8   : > { %v2127_v59 = vand.u32 2147483647, %v2117_v41  ;;  %vm2123_vm4 = vweird.f32 %v2117_v41  ;;  %v2107_v6 = vmul.f32 %v2106_v61, %v3429_v7 }
 0x9d9   : > { %v2155_v57 = vadd.f32 0.4994258, %v2154_v19  ;;  %v2144_v58 = vadd.f32 0.18741608, %v2143_v62  ;;  %v2130_v49 = vor.u32 1.1754944e-38, %v2129_v52 }
 0x9da   : > { %vm2128_vm9 = vcmp.eq.f32.partialorder %v2127_v59, 8.507059e+37  ;;  %v2742_v19 = vld [vmem:[%s3516_s18] ss:$0 sm:$0xff] }
 0x9db   : > { %v2156_v46 = vmul.f32 %v2155_v57, %v2136_v23  ;;  %v2145_v4 = vmul.f32 %v2144_v58, %v2136_v23 }
 0x9dd   : > { %v2772_v47 = vpop.eup %2771  ;;  %v2157_v33 = vadd.f32 1.0, %v2156_v46  ;;  %v2146_v56 = vadd.f32 1.1283791, %v2145_v4 }
 0x9de   : > { %v2119_v48 = vmul.f32 %v2772_v47, %v2117_v41  ;;  %vm2124_vm3 = vweird.f32 %v2772_v47  ;;  %v1900_v41 = vpop.f32.mrf.mxu3 }
 0x9df   : > { %2773 = vrcp.f32 %v2157_v33  ;;  %vm2125_vm8 = vmor %vm2123_vm4, %vm2124_vm3  ;;  %v2169_v11 = vand.u32 2147483648, %v2157_v33  ;;  %v2167_v10 = vand.u32 2147483647, %v2157_v33  ;;  %vm2163_vm11 = vweird.f32 %v2157_v33 }
 0x9e0   : > { %v2120_v53 = vsub.f32 1.0, %v2119_v48  ;;  %v2147_v1 = vmul.f32 %v2146_v56, %v3436_v60  ;;  %v2604_v60 = vld [vmem:[%s3515_s17] sm:$0xff]  ;;  %v1901_v14 = vadd.f32 %v2740_v42, %v1900_v41 }
 0x9e1   : > { %v2170_v16 = vor.u32 1.1754944e-38, %v2169_v11  ;;  %vm2168_vm13 = vcmp.eq.f32.partialorder %v2167_v10, 8.507059e+37  ;;  %2244 = vmatpush.bf16.msra.mxu3 %v2604_v60 }
 0x9e2   : > { %v2121_v54 = vmul.f32 %v2772_v47, %v2120_v53 }
 0x9e4   : > { %v2122_v0 = vadd.f32 %v2772_v47, %v2121_v54 }
 0x9e5   : > { %v2774_v63 = vpop.eup %2773 }
 0x9e6   : > { %v2126_v2 = vsel %vm2125_vm8, %v2772_v47, %v2122_v0  ;;  %v2159_v5 = vmul.f32 %v2774_v63, %v2157_v33  ;;  %vm2164_vm10 = vweird.f32 %v2774_v63  ;;  %v1902_v29 = vpop.f32.mrf.mxu3 }
 0x9e7   : > { %v2131_v45 = vsel %vm2128_vm9, %v2130_v49, %v2126_v2  ;;  %vm2165_vm12 = vmor %vm2163_vm11, %vm2164_vm10  ;;  %v1903_v47 = vadd.f32 %v2740_v42, %v1902_v29 }
 0x9e8   : > { %v2160_v37 = vsub.f32 1.0, %v2159_v5  ;;  %v2132_v43 = vmul.f32 %v2131_v45, %v2107_v6 }
 0x9ea   : > { %v2161_v17 = vmul.f32 %v2774_v63, %v2160_v37  ;;  %v2539_v20 = vclamps-f32 %v2132_v43, 1.0 }
 0x9ec   : > { %v2162_v15 = vadd.f32 %v2774_v63, %v2161_v17  ;;  %v2175_v24 = vadd.f32 1.0, %v2539_v20 }
 0x9ee   : > { %v2166_v21 = vsel %vm2165_vm12, %v2774_v63, %v2162_v15  ;;  %v2177_v38 = vmul.f32 %v2175_v24, %v2091_v8 }
 0x9ef   : > { %v2171_v22 = vsel %vm2168_vm13, %v2170_v16, %v2166_v21 }
 0x9f0   : > { %v2172_v23 = vmul.f32 %v2171_v22, %v2147_v1 }
 0x9f2   : > { %v2540_v7 = vclamps-f32 %v2172_v23, 1.0 }
 0x9f4   : > { %v2176_v27 = vadd.f32 1.0, %v2540_v7 }
 0x9f6   : > { %v2178_v3 = vmul.f32 %v2176_v27, %v2092_v26 }
 0x9f8   : > { %v2728_v25 = vpack.i.bf16 0.0, %v2178_v3  ;;  %v2723_v55 = vpack.i.bf16 %v2178_v3, %v2177_v38 }
 0x9fa   : > { %2729 = vrot.lane.b32.xlu1 %v2728_v25, %s3551_s1  ;;  %2724 = vrot.lane.b32.xlu0 %v2723_v55, %s2842_s7  ;;  %s647_s1 = sand.u32 1, %s2829_s25   ;;  %s2267_s7 = scalar_lea.hbm %s3519_s21, %s2607_s4 }
 0x9fb   : > { %s2337_s30 = sshll.u32 %s647_s1, 4  ;;  %s2270_s29 = sshll.u32 %s2267_s7, 4  ;;  %s2271_s29 = int_to_ptr.hbm [resolvable:$true] %s2270_s29 }
 0x9fc   : > { %s649_s8 = scalar_lea.vmem [#allocation2], %s2337_s30  ;;  %s2256_s3 = scalar_lea.sflag [#allocation3], %s647_s1 }
 0x9fd   : > { %s2268_s26 = sshll.u32 %s649_s8, 4  ;;  %s2789_s9 = sshra.s32 %s2271_s29, 4  ;;  %s2269_s26 = int_to_ptr.vmem [resolvable:$true] %s2268_s26  ;;  %s2790_s9 = int_to_ptr.hbm [resolvable:$true] %s2789_s9 }
 0x9fe   : > { %s2791_s0 = scalar_lea.hbm %s2790_s9, 16  ;;  %s2795_s4 = scalar_lea.hbm %s3519_s21, 32 }
 0x9ff   : > { %p2792_p11 = scmp.ne.s32.totalorder %s2790_s9, %s2791_s0  ;;  %p2796_p0 = scmp.lt.s32.totalorder %s2790_s9, %s3519_s21 }
 0xa00   : > { %p2797_p1 = scmp.lt.s32.totalorder %s2795_s4, %s2791_s0 }
 0xa01   : > { %p2793_p12 = pnand %p2792_p11, %p2993_p5 }
 0xa02   : > { %p2798_p2 = por %p2797_p1, %p2796_p0 }
 0xa03   : > { %p2794_p13 = pneg %p2793_p12 }
 0xa05   : > { %p2799_p3 = pnand %p2798_p2, %p2794_p13 }
 0xa6c   : > { %v2730_v18 = vpop.permute.xlu1 %2729  ;;  %v2725_v9 = vpop.permute.xlu0 %2724 }
 0xa6d   : > { %v2732_v30 = vunpack.i.h.bf16 %v2730_v18  ;;  %v2731_v12 = vunpack.i.l.bf16 %v2730_v18  ;;  %v2727_v31 = vunpack.i.h.bf16 %v2725_v9  ;;  %v2726_v13 = vunpack.i.l.bf16 %v2725_v9 }
 0xa6f   : > { %v2208_v32 = vsel %vm2206_vm14, %v2177_v38, %v2727_v31  ;;  %v2207_v34 = vsel %vm2206_vm14, 0.0, %v2726_v13 }
 0xa70   : > { %v2210_v35 = vsel %vm844_vm2, %v2208_v32, %v2732_v30  ;;  %v2209_v36 = vsel %vm844_vm2, %v2207_v34, %v2731_v12 }
 0xa71   : > { %v2211_v40 = vpack.c.bf16 %v2210_v35, %v2209_v36 }
 0xa73   : > { %2553 = vmatmul.msk.bf16.vlgmr.msra.gmra.mxu3 %vm2233_vm15, %v2211_v40 }
 0xaf6   : > { %v2246_v28 = vpop.f32.mrf.mxu3 }
 0xaf7   : > { %v2247_v57 = vadd.f32 %v2742_v19, %v2246_v28 }
 0xaf9   : > { %v2251_v44 = vadd.f32 %v2247_v57, %v1901_v14 }
 0xafb   : > { %2253 = vst.msk [vmem:[%s649_s8] sm:$0xff] %vm2206_vm14, %v2251_v44 }
 0xafe   : > { %v2248_v46 = vpop.f32.mrf.mxu3 }
 0xaff   : > { %v2249_v50 = vadd.f32 %v2742_v19, %v2248_v46 }
 0xb01   : > { %v2252_v51 = vadd.f32 %v2249_v50, %v1903_v47 }
 0xb03   : > { %2254 = vst.msk [vmem:[%s649_s8 + $0x8] sm:$0xff] %vm2206_vm14, %v2252_v51 }
 0xb04   : > { %2802 = shalt.err (!%p2799_p3)
}
 0xb05   : > { %s2843_s1 = smov 128   ;;  %s2844_s7 = smov 8  }
 0xb06   : > { %2608 = dma.vmem_to_hbm [thread:$0]  (%p2993_p5), %s2269_s26, 256, %s2271_s29, %s2256_s3, %s2843_s1, %s2843_s1, %s2844_s7  }
 0xb07 PF: > { %p2614_p4 = scmp.ge.s32.totalorder %s2837_s27, 2  ;;  %s2285_s8 = sand.u32 1, %s2825_s2  }
 0xb08   : > { %s2286_s28 = scalar_lea.sflag [#allocation3], %s2285_s8 }
 0xb09   : > { %p2611_p7 = pnand %p2614_p4, %p2997_p6 }
 0xb0b   : > { %p2612_p8 = pneg %p2611_p7 }
 0xb0d   : > { %2820 = dma.done.wait (%p2612_p8), %s2286_s28, 256  }
 0xb0e   : > { %2822 = vsyncadd (%p2612_p8), %s2286_s28, 4294967040  ;;  %s3557_s27 = sld [smem:[#allocation6_spill]]  ;;  %s3560_s2 = smov %s2829_s25 }
 0xb0f   : > { %s3558_s9 = sld [smem:[#allocation5_spill]] }
 0xb10   : > { %s3559_s26 = sld [smem:[#allocation7_spill]] }
 0xb14   : > { %p31_p9 = scmp.ge.s32.totalorder %s3557_s27, 4  }
 0xb15   : > { %s3561_s25 = smov %s3558_s9 }
 0xb16   :  { %33 = sbr.rel (!%p31_p9) target bundleno = 14 (0xe), region = 139 }
 0xb1b   :  { %2292 = vsyncpa [#allocation3], 1 }
 0xb1c   :  { %2294 = vsyncpa [#allocation3 + $0x1], 1 }

</bundles_post_ra>
